<compile_context>
chip_gen: v5e
topology: v5e:2x2
jax: 0.10.0
libtpu: 0.0.40
codegen_flags: <defaults>
</compile_context>

<pallas_src>
import math
import functools

import jax
import jax.numpy as jnp
from jax import lax
from jax.experimental import pallas as pl
from jax.experimental.pallas import tpu as pltpu


# ---------------------------------------------------------------------------
# Fused kernel (one batch element per grid step):
#   posenc + num_layers x (norm -> MHA -> add&norm -> squared-ReLU FFN -> add&norm)
# ---------------------------------------------------------------------------
def fused_encoder_kernel(x_ref, pe_ref,
                         wqkv_ref, bqkv_ref,
                         wo_t_ref, bo_ref,
                         w1_t_ref, b1_ref,
                         w2_t_ref, b2_ref,
                         gamma_ref, beta_ref,
                         o_ref,
                         *, nhead, num_layers, emb_scale, eps=1e-5):
    _, S, D = x_ref.shape
    H = nhead
    hd = D // H
    mdt = wqkv_ref.dtype                 # MXU-operand dtype (bf16 by default)

    # ---- shared weights: loaded once, resident for the whole invocation ----
    wqkv = wqkv_ref[...]                                   # (D, 3D)  mdt
    bqkv = bqkv_ref[...].astype(jnp.float32)               # (1, 3D)  f32
    wo_t = wo_t_ref[...]                                   # (D, D)   mdt
    bo = bo_ref[...].astype(jnp.float32)                   # (1, D)
    w1_t = w1_t_ref[...]                                   # (D, F)   mdt
    b1 = b1_ref[...].astype(jnp.float32)                   # (1, F)
    w2_t = w2_t_ref[...]                                   # (F, D)   mdt
    b2 = b2_ref[...].astype(jnp.float32)                   # (1, D)

    # hoisted layernorm affine broadcasts (reused by all 3 * num_layers norms)
    gamma_b = jnp.broadcast_to(gamma_ref[...], (S, D))
    beta_b = jnp.broadcast_to(beta_ref[...], (S, D))

    def layernorm(y):                      # f32 in, f32 out
        mu = jnp.mean(y, axis=-1, keepdims=True)
        var = jnp.mean(jnp.square(y - mu), axis=-1, keepdims=True)
        return (y - mu) * lax.rsqrt(var + eps) * gamma_b + beta_b

    inv_sqrt_hd = 1.0 / math.sqrt(hd)

    def layer_body(_, x):
        # --- pre-norm: src = norm(src) (shared LayerNorm instance) ---
        src = layernorm(x)                                            # (S, D) f32

        # --- QKV: ONE lane-dense (S,D)@(D,3D) matmul, f32 accumulation ---
        qkv = jnp.dot(src.astype(mdt), wqkv,
                      preferred_element_type=jnp.float32) + bqkv      # (S, 3D)
        q = qkv[:, 0 * D:1 * D] * inv_sqrt_hd
        k = qkv[:, 1 * D:2 * D]
        v = qkv[:, 2 * D:3 * D]

        # head split via static lane slices stacked on a new leading axis
        # (no lane-splitting reshape); heads batched inside dot_general below.
        def split_heads(a):
            return jnp.stack([a[:, h * hd:(h + 1) * hd] for h in range(H)],
                             axis=0)                                  # (H, S, hd)

        qh = split_heads(q).astype(mdt)
        kh = split_heads(k).astype(mdt)
        vh = split_heads(v).astype(mdt)

        # --- scaled dot-product attention, stats in f32 ---
        s = jnp.einsum('hqd,hkd->hqk', qh, kh,
                       preferred_element_type=jnp.float32)            # (H, S, S)
        s = s - jnp.max(s, axis=-1, keepdims=True)
        p = jnp.exp(s)
        # approx reciprocal (~2^-12 rel. err) runs on the EUP slot; use
        # approx=False if bit-level parity with the PyTorch reference matters.
        p = p * pl.reciprocal(jnp.sum(p, axis=-1, keepdims=True), approx=True)
        ctx = jnp.einsum('hqk,hkd->hqd', p.astype(mdt), vh,
                         preferred_element_type=jnp.float32)          # (H, S, hd)

        # reassemble heads lane-dense -> (S, D); ONE (S,D)@(D,D) out-projection
        ctx2d = jnp.concatenate([ctx[h] for h in range(H)], axis=-1)  # (S, D)
        src2 = jnp.dot(ctx2d.astype(mdt), wo_t,
                       preferred_element_type=jnp.float32) + bo       # (S, D)

        # --- add & norm (residual on normalized input, as in the reference) ---
        a1 = layernorm(src + src2)

        # --- feed-forward: squared ReLU ---
        h1 = jnp.dot(a1.astype(mdt), w1_t,
                     preferred_element_type=jnp.float32) + b1         # (S, F)
        h1 = jnp.maximum(h1, 0.0)
        h1 = h1 * h1
        ff = jnp.dot(h1.astype(mdt), w2_t,
                     preferred_element_type=jnp.float32) + b2         # (S, D)

        # --- add & norm ---
        return layernorm(a1 + ff)

    # embedding scale + positional encoding (dropout = identity in eval mode)
    x0 = x_ref[0].astype(jnp.float32) * emb_scale + pe_ref[...]
    o_ref[0] = lax.fori_loop(0, num_layers, layer_body, x0, unroll=True)


# ---------------------------------------------------------------------------
# Wrapper: one-time weight re-layout (glue) + pallas_call with grid=(B,)
# ---------------------------------------------------------------------------
def transformer_encoder(src_tokens, emb, pe, params, *, d_model, nhead, num_layers,
                        matmul_dtype=jnp.bfloat16):
    B, S = src_tokens.shape
    D = d_model
    F = params["w1"].shape[0]

    # embedding gather is glue (plain JAX); pe sliced once to (S, D)
    x = emb[src_tokens].astype(jnp.float32)                 # (B, S, D)
    pe_s = pe[0, :S, :].astype(jnp.float32)                 # (S, D)

    # --- torch-style weights -> lane-dense matmul layout (one time, bf16) ---
    wqkv_t = params["wqkv"].T.astype(matmul_dtype)          # (D, 3D)
    wo_t = params["wo"].T.astype(matmul_dtype)              # (D, D)
    w1_t = params["w1"].T.astype(matmul_dtype)              # (D, F)
    w2_t = params["w2"].T.astype(matmul_dtype)              # (F, D)

    kernel = functools.partial(fused_encoder_kernel, nhead=nhead,
                               num_layers=num_layers,
                               emb_scale=math.sqrt(d_model))

    def full(shape):                        # weight tile resident across grid steps
        return pl.BlockSpec(shape, lambda b, _s=shape: (0,) * len(_s))

    out = pl.pallas_call(
        kernel,
        out_shape=jax.ShapeDtypeStruct((B, S, D), jnp.float32),
        grid=(B,),
        in_specs=[
            pl.BlockSpec((1, S, D), lambda b: (b, 0, 0)),   # embeddings (per batch)
            full((S, D)),                                   # positional encoding
            full((D, 3 * D)), full((1, 3 * D)),             # QKV weight / bias
            full((D, D)), full((1, D)),                     # out-proj weight / bias
            full((D, F)), full((1, F)),                     # FFN linear1
            full((F, D)), full((1, D)),                     # FFN linear2
            full((1, D)), full((1, D)),                     # layernorm gamma / beta
        ],
        out_specs=pl.BlockSpec((1, S, D), lambda b: (b, 0, 0)),
        compiler_params=pltpu.CompilerParams(
            dimension_semantics=("parallel",)),             # megacore on v7x
    )(x, pe_s,
      wqkv_t, params["bqkv"], wo_t, params["bo"],
      w1_t, params["b1"], w2_t, params["b2"],
      params["gamma"], params["beta"])

    return out


# ---------------------------------------------------------------------------
# Main
# ---------------------------------------------------------------------------
if __name__ == "__main__":
    input_size = 50          # vocab size
    d_model = 32
    nhead = 4
    num_layers = 2
    dim_feedforward = 64
    max_seq_length = 64
    B, S = 2, 8

    key = jax.random.PRNGKey(0)
    keys = jax.random.split(key, 10)

    emb = 0.02 * jax.random.normal(keys[0], (input_size, d_model), jnp.float32)
    params = {
        "wqkv": 0.02 * jax.random.normal(keys[1], (3 * d_model, d_model), jnp.float32),
        "bqkv": 0.02 * jax.random.normal(keys[2], (1, 3 * d_model), jnp.float32),
        "wo":   0.02 * jax.random.normal(keys[3], (d_model, d_model), jnp.float32),
        "bo":   0.02 * jax.random.normal(keys[4], (1, d_model), jnp.float32),
        "w1":   0.02 * jax.random.normal(keys[5], (dim_feedforward, d_model), jnp.float32),
        "b1":   0.02 * jax.random.normal(keys[6], (1, dim_feedforward), jnp.float32),
        "w2":   0.02 * jax.random.normal(keys[7], (d_model, dim_feedforward), jnp.float32),
        "b2":   0.02 * jax.random.normal(keys[8], (1, d_model), jnp.float32),
        "gamma": jnp.ones((1, d_model), jnp.float32),   # torch LayerNorm default init
        "beta":  jnp.zeros((1, d_model), jnp.float32),
    }

    # positional-encoding buffer, same construction as the PyTorch module
    position = jnp.arange(max_seq_length, dtype=jnp.float32)[:, None]
    div_term = jnp.exp(jnp.arange(0, d_model, 2, dtype=jnp.float32)
                       * (-math.log(10000.0) / d_model))
    pe = jnp.stack([jnp.sin(position * div_term),
                    jnp.cos(position * div_term)], axis=-1)
    pe = pe.reshape(1, max_seq_length, d_model)          # even dims = sin, odd = cos

    src_tokens = jax.random.randint(keys[9], (B, S), 0, input_size)

    out = transformer_encoder(src_tokens, emb, pe, params,
                              d_model=d_model, nhead=nhead, num_layers=num_layers)
    jax.block_until_ready(out)
    assert out.shape == (B, S, d_model)
    print("KERNEL_OK")
</pallas_src>

<mosaic_0001>
module attributes {stable_mosaic.version = 11 : i64} {
  func.func @fused_encoder_kernel(%arg0: i32, %arg1: memref<1x8x32xf32, #tpu.memory_space<vmem>>, %arg2: memref<8x32xf32, #tpu.memory_space<vmem>>, %arg3: memref<32x96xbf16, #tpu.memory_space<vmem>>, %arg4: memref<1x96xf32, #tpu.memory_space<vmem>>, %arg5: memref<32x32xbf16, #tpu.memory_space<vmem>>, %arg6: memref<1x32xf32, #tpu.memory_space<vmem>>, %arg7: memref<32x64xbf16, #tpu.memory_space<vmem>>, %arg8: memref<1x64xf32, #tpu.memory_space<vmem>>, %arg9: memref<64x32xbf16, #tpu.memory_space<vmem>>, %arg10: memref<1x32xf32, #tpu.memory_space<vmem>>, %arg11: memref<1x32xf32, #tpu.memory_space<vmem>>, %arg12: memref<1x32xf32, #tpu.memory_space<vmem>>, %arg13: memref<1x8x32xf32, #tpu.memory_space<vmem>>) attributes {dimension_semantics = [#tpu.dimension_semantics<parallel>], iteration_bounds = array<i64: 2>, scalar_prefetch = 0 : i64, scratch_operands = 0 : i64, tpu.core_type = #tpu.core_type<tc>, window_params = [{transform_indices = @transform_0, window_bounds = array<i64: 1, 8, 32>}, {pipeline_mode = #tpu.pipeline_mode<synchronous>, transform_indices = @transform_1, window_bounds = array<i64: 8, 32>}, {pipeline_mode = #tpu.pipeline_mode<synchronous>, transform_indices = @transform_2, window_bounds = array<i64: 32, 96>}, {pipeline_mode = #tpu.pipeline_mode<synchronous>, transform_indices = @transform_3, window_bounds = array<i64: 1, 96>}, {pipeline_mode = #tpu.pipeline_mode<synchronous>, transform_indices = @transform_4, window_bounds = array<i64: 32, 32>}, {pipeline_mode = #tpu.pipeline_mode<synchronous>, transform_indices = @transform_5, window_bounds = array<i64: 1, 32>}, {pipeline_mode = #tpu.pipeline_mode<synchronous>, transform_indices = @transform_6, window_bounds = array<i64: 32, 64>}, {pipeline_mode = #tpu.pipeline_mode<synchronous>, transform_indices = @transform_7, window_bounds = array<i64: 1, 64>}, {pipeline_mode = #tpu.pipeline_mode<synchronous>, transform_indices = @transform_8, window_bounds = array<i64: 64, 32>}, {pipeline_mode = #tpu.pipeline_mode<synchronous>, transform_indices = @transform_9, window_bounds = array<i64: 1, 32>}, {pipeline_mode = #tpu.pipeline_mode<synchronous>, transform_indices = @transform_10, window_bounds = array<i64: 1, 32>}, {pipeline_mode = #tpu.pipeline_mode<synchronous>, transform_indices = @transform_11, window_bounds = array<i64: 1, 32>}, {transform_indices = @transform_12, window_bounds = array<i64: 1, 8, 32>}]} {
    %c0 = arith.constant 0 : index
    %c0_0 = arith.constant 0 : index
    %0 = vector.load %arg3[%c0, %c0_0] : memref<32x96xbf16, #tpu.memory_space<vmem>>, vector<32x96xbf16>
    %c0_1 = arith.constant 0 : index
    %c0_2 = arith.constant 0 : index
    %1 = vector.load %arg4[%c0_1, %c0_2] : memref<1x96xf32, #tpu.memory_space<vmem>>, vector<1x96xf32>
    %c0_3 = arith.constant 0 : index
    %c0_4 = arith.constant 0 : index
    %2 = vector.load %arg5[%c0_3, %c0_4] : memref<32x32xbf16, #tpu.memory_space<vmem>>, vector<32x32xbf16>
    %c0_5 = arith.constant 0 : index
    %c0_6 = arith.constant 0 : index
    %3 = vector.load %arg6[%c0_5, %c0_6] : memref<1x32xf32, #tpu.memory_space<vmem>>, vector<1x32xf32>
    %c0_7 = arith.constant 0 : index
    %c0_8 = arith.constant 0 : index
    %4 = vector.load %arg7[%c0_7, %c0_8] : memref<32x64xbf16, #tpu.memory_space<vmem>>, vector<32x64xbf16>
    %c0_9 = arith.constant 0 : index
    %c0_10 = arith.constant 0 : index
    %5 = vector.load %arg8[%c0_9, %c0_10] : memref<1x64xf32, #tpu.memory_space<vmem>>, vector<1x64xf32>
    %c0_11 = arith.constant 0 : index
    %c0_12 = arith.constant 0 : index
    %6 = vector.load %arg9[%c0_11, %c0_12] : memref<64x32xbf16, #tpu.memory_space<vmem>>, vector<64x32xbf16>
    %c0_13 = arith.constant 0 : index
    %c0_14 = arith.constant 0 : index
    %7 = vector.load %arg10[%c0_13, %c0_14] : memref<1x32xf32, #tpu.memory_space<vmem>>, vector<1x32xf32>
    %c0_15 = arith.constant 0 : index
    %c0_16 = arith.constant 0 : index
    %8 = vector.load %arg11[%c0_15, %c0_16] : memref<1x32xf32, #tpu.memory_space<vmem>>, vector<1x32xf32>
    %9 = vector.shape_cast %8 : vector<1x32xf32> to vector<1x32xf32>
    %10 = vector.broadcast %9 : vector<1x32xf32> to vector<8x32xf32>
    %c0_17 = arith.constant 0 : index
    %c0_18 = arith.constant 0 : index
    %11 = vector.load %arg12[%c0_17, %c0_18] : memref<1x32xf32, #tpu.memory_space<vmem>>, vector<1x32xf32>
    %12 = vector.shape_cast %11 : vector<1x32xf32> to vector<1x32xf32>
    %13 = vector.broadcast %12 : vector<1x32xf32> to vector<8x32xf32>
    %c0_19 = arith.constant 0 : index
    %c0_20 = arith.constant 0 : index
    %c0_21 = arith.constant 0 : index
    %14 = vector.load %arg1[%c0_19, %c0_20, %c0_21] : memref<1x8x32xf32, #tpu.memory_space<vmem>>, vector<1x8x32xf32>
    %15 = vector.shape_cast %14 : vector<1x8x32xf32> to vector<8x32xf32>
    %cst = arith.constant 5.65685415 : f32
    %16 = vector.broadcast %cst : f32 to vector<8x32xf32>
    %17 = arith.mulf %15, %16 : vector<8x32xf32>
    %c0_22 = arith.constant 0 : index
    %c0_23 = arith.constant 0 : index
    %18 = vector.load %arg2[%c0_22, %c0_23] : memref<8x32xf32, #tpu.memory_space<vmem>>, vector<8x32xf32>
    %19 = arith.addf %17, %18 : vector<8x32xf32>
    %c0_i32 = arith.constant 0 : i32
    %cst_24 = arith.constant dense<0.000000e+00> : vector<8xf32>
    %20 = vector.multi_reduction <add>, %19, %cst_24 [1] : vector<8x32xf32> to vector<8xf32>
    %21 = vector.shape_cast %20 : vector<8xf32> to vector<8x1xf32>
    %cst_25 = arith.constant 3.200000e+01 : f32
    %22 = vector.broadcast %cst_25 : f32 to vector<8x1xf32>
    %23 = arith.divf %21, %22 : vector<8x1xf32>
    %24 = vector.broadcast %23 : vector<8x1xf32> to vector<8x32xf32>
    %25 = arith.subf %19, %24 : vector<8x32xf32>
    %26 = arith.mulf %25, %25 : vector<8x32xf32>
    %cst_26 = arith.constant dense<0.000000e+00> : vector<8xf32>
    %27 = vector.multi_reduction <add>, %26, %cst_26 [1] : vector<8x32xf32> to vector<8xf32>
    %28 = vector.shape_cast %27 : vector<8xf32> to vector<8x1xf32>
    %cst_27 = arith.constant 3.200000e+01 : f32
    %29 = vector.broadcast %cst_27 : f32 to vector<8x1xf32>
    %30 = arith.divf %28, %29 : vector<8x1xf32>
    %31 = vector.broadcast %23 : vector<8x1xf32> to vector<8x32xf32>
    %32 = arith.subf %19, %31 : vector<8x32xf32>
    %cst_28 = arith.constant 9.99999974E-6 : f32
    %33 = vector.broadcast %cst_28 : f32 to vector<8x1xf32>
    %34 = arith.addf %30, %33 : vector<8x1xf32>
    %35 = math.rsqrt %34 : vector<8x1xf32>
    %36 = vector.broadcast %35 : vector<8x1xf32> to vector<8x32xf32>
    %37 = arith.mulf %32, %36 : vector<8x32xf32>
    %38 = arith.mulf %37, %10 : vector<8x32xf32>
    %39 = arith.addf %38, %13 : vector<8x32xf32>
    %40 = arith.truncf %39 : vector<8x32xf32> to vector<8x32xbf16>
    %cst_29 = arith.constant dense<0.000000e+00> : vector<8x96xf32>
    %41 = tpu.matmul %40, %0, %cst_29 {dimension_numbers = #tpu.dot_dimension_numbers<[1], [0], [0], [1], [0, 0, 1, 1], [], []>} : vector<8x32xbf16>, vector<32x96xbf16>, vector<8x96xf32> -> vector<8x96xf32>
    %42 = vector.broadcast %1 : vector<1x96xf32> to vector<8x96xf32>
    %43 = arith.addf %41, %42 : vector<8x96xf32>
    %44 = vector.extract_strided_slice %43 {offsets = [0, 0], sizes = [8, 32], strides = [1, 1]} : vector<8x96xf32> to vector<8x32xf32>
    %cst_30 = arith.constant 0.353553385 : f32
    %45 = vector.broadcast %cst_30 : f32 to vector<8x32xf32>
    %46 = arith.mulf %44, %45 : vector<8x32xf32>
    %47 = vector.extract_strided_slice %43 {offsets = [0, 32], sizes = [8, 32], strides = [1, 1]} : vector<8x96xf32> to vector<8x32xf32>
    %48 = vector.extract_strided_slice %43 {offsets = [0, 64], sizes = [8, 32], strides = [1, 1]} : vector<8x96xf32> to vector<8x32xf32>
    %49 = vector.extract_strided_slice %46 {offsets = [0, 0], sizes = [8, 8], strides = [1, 1]} : vector<8x32xf32> to vector<8x8xf32>
    %50 = vector.extract_strided_slice %46 {offsets = [0, 8], sizes = [8, 8], strides = [1, 1]} : vector<8x32xf32> to vector<8x8xf32>
    %51 = vector.extract_strided_slice %46 {offsets = [0, 16], sizes = [8, 8], strides = [1, 1]} : vector<8x32xf32> to vector<8x8xf32>
    %52 = vector.extract_strided_slice %46 {offsets = [0, 24], sizes = [8, 8], strides = [1, 1]} : vector<8x32xf32> to vector<8x8xf32>
    %53 = vector.shape_cast %49 : vector<8x8xf32> to vector<1x8x8xf32>
    %54 = vector.shape_cast %50 : vector<8x8xf32> to vector<1x8x8xf32>
    %55 = vector.shape_cast %51 : vector<8x8xf32> to vector<1x8x8xf32>
    %56 = vector.shape_cast %52 : vector<8x8xf32> to vector<1x8x8xf32>
    %57 = tpu.concatenate %53, %54, %55, %56 in 0 : vector<1x8x8xf32>, vector<1x8x8xf32>, vector<1x8x8xf32>, vector<1x8x8xf32> -> vector<4x8x8xf32>
    %58 = arith.truncf %57 : vector<4x8x8xf32> to vector<4x8x8xbf16>
    %59 = vector.extract_strided_slice %47 {offsets = [0, 0], sizes = [8, 8], strides = [1, 1]} : vector<8x32xf32> to vector<8x8xf32>
    %60 = vector.extract_strided_slice %47 {offsets = [0, 8], sizes = [8, 8], strides = [1, 1]} : vector<8x32xf32> to vector<8x8xf32>
    %61 = vector.extract_strided_slice %47 {offsets = [0, 16], sizes = [8, 8], strides = [1, 1]} : vector<8x32xf32> to vector<8x8xf32>
    %62 = vector.extract_strided_slice %47 {offsets = [0, 24], sizes = [8, 8], strides = [1, 1]} : vector<8x32xf32> to vector<8x8xf32>
    %63 = vector.shape_cast %59 : vector<8x8xf32> to vector<1x8x8xf32>
    %64 = vector.shape_cast %60 : vector<8x8xf32> to vector<1x8x8xf32>
    %65 = vector.shape_cast %61 : vector<8x8xf32> to vector<1x8x8xf32>
    %66 = vector.shape_cast %62 : vector<8x8xf32> to vector<1x8x8xf32>
    %67 = tpu.concatenate %63, %64, %65, %66 in 0 : vector<1x8x8xf32>, vector<1x8x8xf32>, vector<1x8x8xf32>, vector<1x8x8xf32> -> vector<4x8x8xf32>
    %68 = arith.truncf %67 : vector<4x8x8xf32> to vector<4x8x8xbf16>
    %69 = vector.extract_strided_slice %48 {offsets = [0, 0], sizes = [8, 8], strides = [1, 1]} : vector<8x32xf32> to vector<8x8xf32>
    %70 = vector.extract_strided_slice %48 {offsets = [0, 8], sizes = [8, 8], strides = [1, 1]} : vector<8x32xf32> to vector<8x8xf32>
    %71 = vector.extract_strided_slice %48 {offsets = [0, 16], sizes = [8, 8], strides = [1, 1]} : vector<8x32xf32> to vector<8x8xf32>
    %72 = vector.extract_strided_slice %48 {offsets = [0, 24], sizes = [8, 8], strides = [1, 1]} : vector<8x32xf32> to vector<8x8xf32>
    %73 = vector.shape_cast %69 : vector<8x8xf32> to vector<1x8x8xf32>
    %74 = vector.shape_cast %70 : vector<8x8xf32> to vector<1x8x8xf32>
    %75 = vector.shape_cast %71 : vector<8x8xf32> to vector<1x8x8xf32>
    %76 = vector.shape_cast %72 : vector<8x8xf32> to vector<1x8x8xf32>
    %77 = tpu.concatenate %73, %74, %75, %76 in 0 : vector<1x8x8xf32>, vector<1x8x8xf32>, vector<1x8x8xf32>, vector<1x8x8xf32> -> vector<4x8x8xf32>
    %78 = arith.truncf %77 : vector<4x8x8xf32> to vector<4x8x8xbf16>
    "tpu.trace_start"() <{level = 10 : i32, message = "hqd,hkd->hqk"}> : () -> ()
    %cst_31 = arith.constant dense<0.000000e+00> : vector<4x8x8xf32>
    %79 = tpu.matmul %58, %68, %cst_31 {dimension_numbers = #tpu.dot_dimension_numbers<[2], [2], [1], [1], [0, 0, 0, 1, 1, 1], [0], [0]>} : vector<4x8x8xbf16>, vector<4x8x8xbf16>, vector<4x8x8xf32> -> vector<4x8x8xf32>
    "tpu.trace_stop"() : () -> ()
    %cst_32 = arith.constant dense<0xFF800000> : vector<4x8xf32>
    %80 = vector.multi_reduction <maximumf>, %79, %cst_32 [2] : vector<4x8x8xf32> to vector<4x8xf32>
    %81 = vector.shape_cast %80 : vector<4x8xf32> to vector<4x8x1xf32>
    %82 = vector.broadcast %81 : vector<4x8x1xf32> to vector<4x8x8xf32>
    %83 = arith.subf %79, %82 : vector<4x8x8xf32>
    %84 = math.exp %83 : vector<4x8x8xf32>
    %cst_33 = arith.constant dense<0.000000e+00> : vector<4x8xf32>
    %85 = vector.multi_reduction <add>, %84, %cst_33 [2] : vector<4x8x8xf32> to vector<4x8xf32>
    %86 = vector.shape_cast %85 : vector<4x8xf32> to vector<4x8x1xf32>
    %87 = tpu.reciprocal %86 {approx = true} : vector<4x8x1xf32> -> vector<4x8x1xf32>
    %88 = vector.broadcast %87 : vector<4x8x1xf32> to vector<4x8x8xf32>
    %89 = arith.mulf %84, %88 : vector<4x8x8xf32>
    %90 = arith.truncf %89 : vector<4x8x8xf32> to vector<4x8x8xbf16>
    "tpu.trace_start"() <{level = 10 : i32, message = "hqk,hkd->hqd"}> : () -> ()
    %cst_34 = arith.constant dense<0.000000e+00> : vector<4x8x8xf32>
    %91 = tpu.matmul %90, %78, %cst_34 {dimension_numbers = #tpu.dot_dimension_numbers<[2], [1], [1], [2], [0, 0, 0, 1, 1, 2], [0], [0]>} : vector<4x8x8xbf16>, vector<4x8x8xbf16>, vector<4x8x8xf32> -> vector<4x8x8xf32>
    "tpu.trace_stop"() : () -> ()
    %92 = vector.extract_strided_slice %91 {offsets = [0, 0, 0], sizes = [1, 8, 8], strides = [1, 1, 1]} : vector<4x8x8xf32> to vector<1x8x8xf32>
    %93 = vector.shape_cast %92 : vector<1x8x8xf32> to vector<8x8xf32>
    %94 = vector.extract_strided_slice %91 {offsets = [1, 0, 0], sizes = [1, 8, 8], strides = [1, 1, 1]} : vector<4x8x8xf32> to vector<1x8x8xf32>
    %95 = vector.shape_cast %94 : vector<1x8x8xf32> to vector<8x8xf32>
    %96 = vector.extract_strided_slice %91 {offsets = [2, 0, 0], sizes = [1, 8, 8], strides = [1, 1, 1]} : vector<4x8x8xf32> to vector<1x8x8xf32>
    %97 = vector.shape_cast %96 : vector<1x8x8xf32> to vector<8x8xf32>
    %98 = vector.extract_strided_slice %91 {offsets = [3, 0, 0], sizes = [1, 8, 8], strides = [1, 1, 1]} : vector<4x8x8xf32> to vector<1x8x8xf32>
    %99 = vector.shape_cast %98 : vector<1x8x8xf32> to vector<8x8xf32>
    %100 = tpu.concatenate %93, %95, %97, %99 in 1 : vector<8x8xf32>, vector<8x8xf32>, vector<8x8xf32>, vector<8x8xf32> -> vector<8x32xf32>
    %101 = arith.truncf %100 : vector<8x32xf32> to vector<8x32xbf16>
    %cst_35 = arith.constant dense<0.000000e+00> : vector<8x32xf32>
    %102 = tpu.matmul %101, %2, %cst_35 {dimension_numbers = #tpu.dot_dimension_numbers<[1], [0], [0], [1], [0, 0, 1, 1], [], []>} : vector<8x32xbf16>, vector<32x32xbf16>, vector<8x32xf32> -> vector<8x32xf32>
    %103 = vector.broadcast %3 : vector<1x32xf32> to vector<8x32xf32>
    %104 = arith.addf %102, %103 : vector<8x32xf32>
    %105 = arith.addf %39, %104 : vector<8x32xf32>
    %cst_36 = arith.constant dense<0.000000e+00> : vector<8xf32>
    %106 = vector.multi_reduction <add>, %105, %cst_36 [1] : vector<8x32xf32> to vector<8xf32>
    %107 = vector.shape_cast %106 : vector<8xf32> to vector<8x1xf32>
    %cst_37 = arith.constant 3.200000e+01 : f32
    %108 = vector.broadcast %cst_37 : f32 to vector<8x1xf32>
    %109 = arith.divf %107, %108 : vector<8x1xf32>
    %110 = vector.broadcast %109 : vector<8x1xf32> to vector<8x32xf32>
    %111 = arith.subf %105, %110 : vector<8x32xf32>
    %112 = arith.mulf %111, %111 : vector<8x32xf32>
    %cst_38 = arith.constant dense<0.000000e+00> : vector<8xf32>
    %113 = vector.multi_reduction <add>, %112, %cst_38 [1] : vector<8x32xf32> to vector<8xf32>
    %114 = vector.shape_cast %113 : vector<8xf32> to vector<8x1xf32>
    %cst_39 = arith.constant 3.200000e+01 : f32
    %115 = vector.broadcast %cst_39 : f32 to vector<8x1xf32>
    %116 = arith.divf %114, %115 : vector<8x1xf32>
    %117 = vector.broadcast %109 : vector<8x1xf32> to vector<8x32xf32>
    %118 = arith.subf %105, %117 : vector<8x32xf32>
    %cst_40 = arith.constant 9.99999974E-6 : f32
    %119 = vector.broadcast %cst_40 : f32 to vector<8x1xf32>
    %120 = arith.addf %116, %119 : vector<8x1xf32>
    %121 = math.rsqrt %120 : vector<8x1xf32>
    %122 = vector.broadcast %121 : vector<8x1xf32> to vector<8x32xf32>
    %123 = arith.mulf %118, %122 : vector<8x32xf32>
    %124 = arith.mulf %123, %10 : vector<8x32xf32>
    %125 = arith.addf %124, %13 : vector<8x32xf32>
    %126 = arith.truncf %125 : vector<8x32xf32> to vector<8x32xbf16>
    %cst_41 = arith.constant dense<0.000000e+00> : vector<8x64xf32>
    %127 = tpu.matmul %126, %4, %cst_41 {dimension_numbers = #tpu.dot_dimension_numbers<[1], [0], [0], [1], [0, 0, 1, 1], [], []>} : vector<8x32xbf16>, vector<32x64xbf16>, vector<8x64xf32> -> vector<8x64xf32>
    %128 = vector.broadcast %5 : vector<1x64xf32> to vector<8x64xf32>
    %129 = arith.addf %127, %128 : vector<8x64xf32>
    %cst_42 = arith.constant 0.000000e+00 : f32
    %130 = vector.broadcast %cst_42 : f32 to vector<8x64xf32>
    %131 = arith.maximumf %129, %130 : vector<8x64xf32>
    %132 = arith.mulf %131, %131 : vector<8x64xf32>
    %133 = arith.truncf %132 : vector<8x64xf32> to vector<8x64xbf16>
    %cst_43 = arith.constant dense<0.000000e+00> : vector<8x32xf32>
    %134 = tpu.matmul %133, %6, %cst_43 {dimension_numbers = #tpu.dot_dimension_numbers<[1], [0], [0], [1], [0, 0, 1, 1], [], []>} : vector<8x64xbf16>, vector<64x32xbf16>, vector<8x32xf32> -> vector<8x32xf32>
    %135 = vector.broadcast %7 : vector<1x32xf32> to vector<8x32xf32>
    %136 = arith.addf %134, %135 : vector<8x32xf32>
    %137 = arith.addf %125, %136 : vector<8x32xf32>
    %cst_44 = arith.constant dense<0.000000e+00> : vector<8xf32>
    %138 = vector.multi_reduction <add>, %137, %cst_44 [1] : vector<8x32xf32> to vector<8xf32>
    %139 = vector.shape_cast %138 : vector<8xf32> to vector<8x1xf32>
    %cst_45 = arith.constant 3.200000e+01 : f32
    %140 = vector.broadcast %cst_45 : f32 to vector<8x1xf32>
    %141 = arith.divf %139, %140 : vector<8x1xf32>
    %142 = vector.broadcast %141 : vector<8x1xf32> to vector<8x32xf32>
    %143 = arith.subf %137, %142 : vector<8x32xf32>
    %144 = arith.mulf %143, %143 : vector<8x32xf32>
    %cst_46 = arith.constant dense<0.000000e+00> : vector<8xf32>
    %145 = vector.multi_reduction <add>, %144, %cst_46 [1] : vector<8x32xf32> to vector<8xf32>
    %146 = vector.shape_cast %145 : vector<8xf32> to vector<8x1xf32>
    %cst_47 = arith.constant 3.200000e+01 : f32
    %147 = vector.broadcast %cst_47 : f32 to vector<8x1xf32>
    %148 = arith.divf %146, %147 : vector<8x1xf32>
    %149 = vector.broadcast %141 : vector<8x1xf32> to vector<8x32xf32>
    %150 = arith.subf %137, %149 : vector<8x32xf32>
    %cst_48 = arith.constant 9.99999974E-6 : f32
    %151 = vector.broadcast %cst_48 : f32 to vector<8x1xf32>
    %152 = arith.addf %148, %151 : vector<8x1xf32>
    %153 = math.rsqrt %152 : vector<8x1xf32>
    %154 = vector.broadcast %153 : vector<8x1xf32> to vector<8x32xf32>
    %155 = arith.mulf %150, %154 : vector<8x32xf32>
    %156 = arith.mulf %155, %10 : vector<8x32xf32>
    %157 = arith.addf %156, %13 : vector<8x32xf32>
    %c1_i32 = arith.constant 1 : i32
    %cst_49 = arith.constant dense<0.000000e+00> : vector<8xf32>
    %158 = vector.multi_reduction <add>, %157, %cst_49 [1] : vector<8x32xf32> to vector<8xf32>
    %159 = vector.shape_cast %158 : vector<8xf32> to vector<8x1xf32>
    %cst_50 = arith.constant 3.200000e+01 : f32
    %160 = vector.broadcast %cst_50 : f32 to vector<8x1xf32>
    %161 = arith.divf %159, %160 : vector<8x1xf32>
    %162 = vector.broadcast %161 : vector<8x1xf32> to vector<8x32xf32>
    %163 = arith.subf %157, %162 : vector<8x32xf32>
    %164 = arith.mulf %163, %163 : vector<8x32xf32>
    %cst_51 = arith.constant dense<0.000000e+00> : vector<8xf32>
    %165 = vector.multi_reduction <add>, %164, %cst_51 [1] : vector<8x32xf32> to vector<8xf32>
    %166 = vector.shape_cast %165 : vector<8xf32> to vector<8x1xf32>
    %cst_52 = arith.constant 3.200000e+01 : f32
    %167 = vector.broadcast %cst_52 : f32 to vector<8x1xf32>
    %168 = arith.divf %166, %167 : vector<8x1xf32>
    %169 = vector.broadcast %161 : vector<8x1xf32> to vector<8x32xf32>
    %170 = arith.subf %157, %169 : vector<8x32xf32>
    %cst_53 = arith.constant 9.99999974E-6 : f32
    %171 = vector.broadcast %cst_53 : f32 to vector<8x1xf32>
    %172 = arith.addf %168, %171 : vector<8x1xf32>
    %173 = math.rsqrt %172 : vector<8x1xf32>
    %174 = vector.broadcast %173 : vector<8x1xf32> to vector<8x32xf32>
    %175 = arith.mulf %170, %174 : vector<8x32xf32>
    %176 = arith.mulf %175, %10 : vector<8x32xf32>
    %177 = arith.addf %176, %13 : vector<8x32xf32>
    %178 = arith.truncf %177 : vector<8x32xf32> to vector<8x32xbf16>
    %cst_54 = arith.constant dense<0.000000e+00> : vector<8x96xf32>
    %179 = tpu.matmul %178, %0, %cst_54 {dimension_numbers = #tpu.dot_dimension_numbers<[1], [0], [0], [1], [0, 0, 1, 1], [], []>} : vector<8x32xbf16>, vector<32x96xbf16>, vector<8x96xf32> -> vector<8x96xf32>
    %180 = vector.broadcast %1 : vector<1x96xf32> to vector<8x96xf32>
    %181 = arith.addf %179, %180 : vector<8x96xf32>
    %182 = vector.extract_strided_slice %181 {offsets = [0, 0], sizes = [8, 32], strides = [1, 1]} : vector<8x96xf32> to vector<8x32xf32>
    %cst_55 = arith.constant 0.353553385 : f32
    %183 = vector.broadcast %cst_55 : f32 to vector<8x32xf32>
    %184 = arith.mulf %182, %183 : vector<8x32xf32>
    %185 = vector.extract_strided_slice %181 {offsets = [0, 32], sizes = [8, 32], strides = [1, 1]} : vector<8x96xf32> to vector<8x32xf32>
    %186 = vector.extract_strided_slice %181 {offsets = [0, 64], sizes = [8, 32], strides = [1, 1]} : vector<8x96xf32> to vector<8x32xf32>
    %187 = vector.extract_strided_slice %184 {offsets = [0, 0], sizes = [8, 8], strides = [1, 1]} : vector<8x32xf32> to vector<8x8xf32>
    %188 = vector.extract_strided_slice %184 {offsets = [0, 8], sizes = [8, 8], strides = [1, 1]} : vector<8x32xf32> to vector<8x8xf32>
    %189 = vector.extract_strided_slice %184 {offsets = [0, 16], sizes = [8, 8], strides = [1, 1]} : vector<8x32xf32> to vector<8x8xf32>
    %190 = vector.extract_strided_slice %184 {offsets = [0, 24], sizes = [8, 8], strides = [1, 1]} : vector<8x32xf32> to vector<8x8xf32>
    %191 = vector.shape_cast %187 : vector<8x8xf32> to vector<1x8x8xf32>
    %192 = vector.shape_cast %188 : vector<8x8xf32> to vector<1x8x8xf32>
    %193 = vector.shape_cast %189 : vector<8x8xf32> to vector<1x8x8xf32>
    %194 = vector.shape_cast %190 : vector<8x8xf32> to vector<1x8x8xf32>
    %195 = tpu.concatenate %191, %192, %193, %194 in 0 : vector<1x8x8xf32>, vector<1x8x8xf32>, vector<1x8x8xf32>, vector<1x8x8xf32> -> vector<4x8x8xf32>
    %196 = arith.truncf %195 : vector<4x8x8xf32> to vector<4x8x8xbf16>
    %197 = vector.extract_strided_slice %185 {offsets = [0, 0], sizes = [8, 8], strides = [1, 1]} : vector<8x32xf32> to vector<8x8xf32>
    %198 = vector.extract_strided_slice %185 {offsets = [0, 8], sizes = [8, 8], strides = [1, 1]} : vector<8x32xf32> to vector<8x8xf32>
    %199 = vector.extract_strided_slice %185 {offsets = [0, 16], sizes = [8, 8], strides = [1, 1]} : vector<8x32xf32> to vector<8x8xf32>
    %200 = vector.extract_strided_slice %185 {offsets = [0, 24], sizes = [8, 8], strides = [1, 1]} : vector<8x32xf32> to vector<8x8xf32>
    %201 = vector.shape_cast %197 : vector<8x8xf32> to vector<1x8x8xf32>
    %202 = vector.shape_cast %198 : vector<8x8xf32> to vector<1x8x8xf32>
    %203 = vector.shape_cast %199 : vector<8x8xf32> to vector<1x8x8xf32>
    %204 = vector.shape_cast %200 : vector<8x8xf32> to vector<1x8x8xf32>
    %205 = tpu.concatenate %201, %202, %203, %204 in 0 : vector<1x8x8xf32>, vector<1x8x8xf32>, vector<1x8x8xf32>, vector<1x8x8xf32> -> vector<4x8x8xf32>
    %206 = arith.truncf %205 : vector<4x8x8xf32> to vector<4x8x8xbf16>
    %207 = vector.extract_strided_slice %186 {offsets = [0, 0], sizes = [8, 8], strides = [1, 1]} : vector<8x32xf32> to vector<8x8xf32>
    %208 = vector.extract_strided_slice %186 {offsets = [0, 8], sizes = [8, 8], strides = [1, 1]} : vector<8x32xf32> to vector<8x8xf32>
    %209 = vector.extract_strided_slice %186 {offsets = [0, 16], sizes = [8, 8], strides = [1, 1]} : vector<8x32xf32> to vector<8x8xf32>
    %210 = vector.extract_strided_slice %186 {offsets = [0, 24], sizes = [8, 8], strides = [1, 1]} : vector<8x32xf32> to vector<8x8xf32>
    %211 = vector.shape_cast %207 : vector<8x8xf32> to vector<1x8x8xf32>
    %212 = vector.shape_cast %208 : vector<8x8xf32> to vector<1x8x8xf32>
    %213 = vector.shape_cast %209 : vector<8x8xf32> to vector<1x8x8xf32>
    %214 = vector.shape_cast %210 : vector<8x8xf32> to vector<1x8x8xf32>
    %215 = tpu.concatenate %211, %212, %213, %214 in 0 : vector<1x8x8xf32>, vector<1x8x8xf32>, vector<1x8x8xf32>, vector<1x8x8xf32> -> vector<4x8x8xf32>
    %216 = arith.truncf %215 : vector<4x8x8xf32> to vector<4x8x8xbf16>
    "tpu.trace_start"() <{level = 10 : i32, message = "hqd,hkd->hqk"}> : () -> ()
    %cst_56 = arith.constant dense<0.000000e+00> : vector<4x8x8xf32>
    %217 = tpu.matmul %196, %206, %cst_56 {dimension_numbers = #tpu.dot_dimension_numbers<[2], [2], [1], [1], [0, 0, 0, 1, 1, 1], [0], [0]>} : vector<4x8x8xbf16>, vector<4x8x8xbf16>, vector<4x8x8xf32> -> vector<4x8x8xf32>
    "tpu.trace_stop"() : () -> ()
    %cst_57 = arith.constant dense<0xFF800000> : vector<4x8xf32>
    %218 = vector.multi_reduction <maximumf>, %217, %cst_57 [2] : vector<4x8x8xf32> to vector<4x8xf32>
    %219 = vector.shape_cast %218 : vector<4x8xf32> to vector<4x8x1xf32>
    %220 = vector.broadcast %219 : vector<4x8x1xf32> to vector<4x8x8xf32>
    %221 = arith.subf %217, %220 : vector<4x8x8xf32>
    %222 = math.exp %221 : vector<4x8x8xf32>
    %cst_58 = arith.constant dense<0.000000e+00> : vector<4x8xf32>
    %223 = vector.multi_reduction <add>, %222, %cst_58 [2] : vector<4x8x8xf32> to vector<4x8xf32>
    %224 = vector.shape_cast %223 : vector<4x8xf32> to vector<4x8x1xf32>
    %225 = tpu.reciprocal %224 {approx = true} : vector<4x8x1xf32> -> vector<4x8x1xf32>
    %226 = vector.broadcast %225 : vector<4x8x1xf32> to vector<4x8x8xf32>
    %227 = arith.mulf %222, %226 : vector<4x8x8xf32>
    %228 = arith.truncf %227 : vector<4x8x8xf32> to vector<4x8x8xbf16>
    "tpu.trace_start"() <{level = 10 : i32, message = "hqk,hkd->hqd"}> : () -> ()
    %cst_59 = arith.constant dense<0.000000e+00> : vector<4x8x8xf32>
    %229 = tpu.matmul %228, %216, %cst_59 {dimension_numbers = #tpu.dot_dimension_numbers<[2], [1], [1], [2], [0, 0, 0, 1, 1, 2], [0], [0]>} : vector<4x8x8xbf16>, vector<4x8x8xbf16>, vector<4x8x8xf32> -> vector<4x8x8xf32>
    "tpu.trace_stop"() : () -> ()
    %230 = vector.extract_strided_slice %229 {offsets = [0, 0, 0], sizes = [1, 8, 8], strides = [1, 1, 1]} : vector<4x8x8xf32> to vector<1x8x8xf32>
    %231 = vector.shape_cast %230 : vector<1x8x8xf32> to vector<8x8xf32>
    %232 = vector.extract_strided_slice %229 {offsets = [1, 0, 0], sizes = [1, 8, 8], strides = [1, 1, 1]} : vector<4x8x8xf32> to vector<1x8x8xf32>
    %233 = vector.shape_cast %232 : vector<1x8x8xf32> to vector<8x8xf32>
    %234 = vector.extract_strided_slice %229 {offsets = [2, 0, 0], sizes = [1, 8, 8], strides = [1, 1, 1]} : vector<4x8x8xf32> to vector<1x8x8xf32>
    %235 = vector.shape_cast %234 : vector<1x8x8xf32> to vector<8x8xf32>
    %236 = vector.extract_strided_slice %229 {offsets = [3, 0, 0], sizes = [1, 8, 8], strides = [1, 1, 1]} : vector<4x8x8xf32> to vector<1x8x8xf32>
    %237 = vector.shape_cast %236 : vector<1x8x8xf32> to vector<8x8xf32>
    %238 = tpu.concatenate %231, %233, %235, %237 in 1 : vector<8x8xf32>, vector<8x8xf32>, vector<8x8xf32>, vector<8x8xf32> -> vector<8x32xf32>
    %239 = arith.truncf %238 : vector<8x32xf32> to vector<8x32xbf16>
    %cst_60 = arith.constant dense<0.000000e+00> : vector<8x32xf32>
    %240 = tpu.matmul %239, %2, %cst_60 {dimension_numbers = #tpu.dot_dimension_numbers<[1], [0], [0], [1], [0, 0, 1, 1], [], []>} : vector<8x32xbf16>, vector<32x32xbf16>, vector<8x32xf32> -> vector<8x32xf32>
    %241 = vector.broadcast %3 : vector<1x32xf32> to vector<8x32xf32>
    %242 = arith.addf %240, %241 : vector<8x32xf32>
    %243 = arith.addf %177, %242 : vector<8x32xf32>
    %cst_61 = arith.constant dense<0.000000e+00> : vector<8xf32>
    %244 = vector.multi_reduction <add>, %243, %cst_61 [1] : vector<8x32xf32> to vector<8xf32>
    %245 = vector.shape_cast %244 : vector<8xf32> to vector<8x1xf32>
    %cst_62 = arith.constant 3.200000e+01 : f32
    %246 = vector.broadcast %cst_62 : f32 to vector<8x1xf32>
    %247 = arith.divf %245, %246 : vector<8x1xf32>
    %248 = vector.broadcast %247 : vector<8x1xf32> to vector<8x32xf32>
    %249 = arith.subf %243, %248 : vector<8x32xf32>
    %250 = arith.mulf %249, %249 : vector<8x32xf32>
    %cst_63 = arith.constant dense<0.000000e+00> : vector<8xf32>
    %251 = vector.multi_reduction <add>, %250, %cst_63 [1] : vector<8x32xf32> to vector<8xf32>
    %252 = vector.shape_cast %251 : vector<8xf32> to vector<8x1xf32>
    %cst_64 = arith.constant 3.200000e+01 : f32
    %253 = vector.broadcast %cst_64 : f32 to vector<8x1xf32>
    %254 = arith.divf %252, %253 : vector<8x1xf32>
    %255 = vector.broadcast %247 : vector<8x1xf32> to vector<8x32xf32>
    %256 = arith.subf %243, %255 : vector<8x32xf32>
    %cst_65 = arith.constant 9.99999974E-6 : f32
    %257 = vector.broadcast %cst_65 : f32 to vector<8x1xf32>
    %258 = arith.addf %254, %257 : vector<8x1xf32>
    %259 = math.rsqrt %258 : vector<8x1xf32>
    %260 = vector.broadcast %259 : vector<8x1xf32> to vector<8x32xf32>
    %261 = arith.mulf %256, %260 : vector<8x32xf32>
    %262 = arith.mulf %261, %10 : vector<8x32xf32>
    %263 = arith.addf %262, %13 : vector<8x32xf32>
    %264 = arith.truncf %263 : vector<8x32xf32> to vector<8x32xbf16>
    %cst_66 = arith.constant dense<0.000000e+00> : vector<8x64xf32>
    %265 = tpu.matmul %264, %4, %cst_66 {dimension_numbers = #tpu.dot_dimension_numbers<[1], [0], [0], [1], [0, 0, 1, 1], [], []>} : vector<8x32xbf16>, vector<32x64xbf16>, vector<8x64xf32> -> vector<8x64xf32>
    %266 = vector.broadcast %5 : vector<1x64xf32> to vector<8x64xf32>
    %267 = arith.addf %265, %266 : vector<8x64xf32>
    %cst_67 = arith.constant 0.000000e+00 : f32
    %268 = vector.broadcast %cst_67 : f32 to vector<8x64xf32>
    %269 = arith.maximumf %267, %268 : vector<8x64xf32>
    %270 = arith.mulf %269, %269 : vector<8x64xf32>
    %271 = arith.truncf %270 : vector<8x64xf32> to vector<8x64xbf16>
    %cst_68 = arith.constant dense<0.000000e+00> : vector<8x32xf32>
    %272 = tpu.matmul %271, %6, %cst_68 {dimension_numbers = #tpu.dot_dimension_numbers<[1], [0], [0], [1], [0, 0, 1, 1], [], []>} : vector<8x64xbf16>, vector<64x32xbf16>, vector<8x32xf32> -> vector<8x32xf32>
    %273 = vector.broadcast %7 : vector<1x32xf32> to vector<8x32xf32>
    %274 = arith.addf %272, %273 : vector<8x32xf32>
    %275 = arith.addf %263, %274 : vector<8x32xf32>
    %cst_69 = arith.constant dense<0.000000e+00> : vector<8xf32>
    %276 = vector.multi_reduction <add>, %275, %cst_69 [1] : vector<8x32xf32> to vector<8xf32>
    %277 = vector.shape_cast %276 : vector<8xf32> to vector<8x1xf32>
    %cst_70 = arith.constant 3.200000e+01 : f32
    %278 = vector.broadcast %cst_70 : f32 to vector<8x1xf32>
    %279 = arith.divf %277, %278 : vector<8x1xf32>
    %280 = vector.broadcast %279 : vector<8x1xf32> to vector<8x32xf32>
    %281 = arith.subf %275, %280 : vector<8x32xf32>
    %282 = arith.mulf %281, %281 : vector<8x32xf32>
    %cst_71 = arith.constant dense<0.000000e+00> : vector<8xf32>
    %283 = vector.multi_reduction <add>, %282, %cst_71 [1] : vector<8x32xf32> to vector<8xf32>
    %284 = vector.shape_cast %283 : vector<8xf32> to vector<8x1xf32>
    %cst_72 = arith.constant 3.200000e+01 : f32
    %285 = vector.broadcast %cst_72 : f32 to vector<8x1xf32>
    %286 = arith.divf %284, %285 : vector<8x1xf32>
    %287 = vector.broadcast %279 : vector<8x1xf32> to vector<8x32xf32>
    %288 = arith.subf %275, %287 : vector<8x32xf32>
    %cst_73 = arith.constant 9.99999974E-6 : f32
    %289 = vector.broadcast %cst_73 : f32 to vector<8x1xf32>
    %290 = arith.addf %286, %289 : vector<8x1xf32>
    %291 = math.rsqrt %290 : vector<8x1xf32>
    %292 = vector.broadcast %291 : vector<8x1xf32> to vector<8x32xf32>
    %293 = arith.mulf %288, %292 : vector<8x32xf32>
    %294 = arith.mulf %293, %10 : vector<8x32xf32>
    %295 = arith.addf %294, %13 : vector<8x32xf32>
    %c0_74 = arith.constant 0 : index
    %c0_75 = arith.constant 0 : index
    %c0_76 = arith.constant 0 : index
    %296 = vector.load %arg13[%c0_74, %c0_75, %c0_76] : memref<1x8x32xf32, #tpu.memory_space<vmem>>, vector<1x8x32xf32>
    %297 = vector.shape_cast %296 : vector<1x8x32xf32> to vector<8x32xf32>
    %298 = vector.shape_cast %295 : vector<8x32xf32> to vector<1x8x32xf32>
    tpu.vector_store %arg13[%c0_74, %c0_75, %c0_76], %298 {strides = array<i32>} : memref<1x8x32xf32, #tpu.memory_space<vmem>>, vector<1x8x32xf32>,
    return
  }
  func.func @transform_0(%arg0: i32) -> (i32, i32, i32) {
    %c0_i32 = arith.constant 0 : i32
    %c0_i32_0 = arith.constant 0 : i32
    %c0_i32_1 = arith.constant 0 : i32
    return %arg0, %c0_i32, %c0_i32_0 : i32, i32, i32
  }
  func.func @transform_1(%arg0: i32) -> (i32, i32) {
    %c0_i32 = arith.constant 0 : i32
    %c0_i32_0 = arith.constant 0 : i32
    %c0_i32_1 = arith.constant 0 : i32
    return %c0_i32, %c0_i32_0 : i32, i32
  }
  func.func @transform_2(%arg0: i32) -> (i32, i32) {
    %c0_i32 = arith.constant 0 : i32
    %c0_i32_0 = arith.constant 0 : i32
    %c0_i32_1 = arith.constant 0 : i32
    return %c0_i32, %c0_i32_0 : i32, i32
  }
  func.func @transform_3(%arg0: i32) -> (i32, i32) {
    %c0_i32 = arith.constant 0 : i32
    %c0_i32_0 = arith.constant 0 : i32
    %c0_i32_1 = arith.constant 0 : i32
    return %c0_i32, %c0_i32_0 : i32, i32
  }
  func.func @transform_4(%arg0: i32) -> (i32, i32) {
    %c0_i32 = arith.constant 0 : i32
    %c0_i32_0 = arith.constant 0 : i32
    %c0_i32_1 = arith.constant 0 : i32
    return %c0_i32, %c0_i32_0 : i32, i32
  }
  func.func @transform_5(%arg0: i32) -> (i32, i32) {
    %c0_i32 = arith.constant 0 : i32
    %c0_i32_0 = arith.constant 0 : i32
    %c0_i32_1 = arith.constant 0 : i32
    return %c0_i32, %c0_i32_0 : i32, i32
  }
  func.func @transform_6(%arg0: i32) -> (i32, i32) {
    %c0_i32 = arith.constant 0 : i32
    %c0_i32_0 = arith.constant 0 : i32
    %c0_i32_1 = arith.constant 0 : i32
    return %c0_i32, %c0_i32_0 : i32, i32
  }
  func.func @transform_7(%arg0: i32) -> (i32, i32) {
    %c0_i32 = arith.constant 0 : i32
    %c0_i32_0 = arith.constant 0 : i32
    %c0_i32_1 = arith.constant 0 : i32
    return %c0_i32, %c0_i32_0 : i32, i32
  }
  func.func @transform_8(%arg0: i32) -> (i32, i32) {
    %c0_i32 = arith.constant 0 : i32
    %c0_i32_0 = arith.constant 0 : i32
    %c0_i32_1 = arith.constant 0 : i32
    return %c0_i32, %c0_i32_0 : i32, i32
  }
  func.func @transform_9(%arg0: i32) -> (i32, i32) {
    %c0_i32 = arith.constant 0 : i32
    %c0_i32_0 = arith.constant 0 : i32
    %c0_i32_1 = arith.constant 0 : i32
    return %c0_i32, %c0_i32_0 : i32, i32
  }
  func.func @transform_10(%arg0: i32) -> (i32, i32) {
    %c0_i32 = arith.constant 0 : i32
    %c0_i32_0 = arith.constant 0 : i32
    %c0_i32_1 = arith.constant 0 : i32
    return %c0_i32, %c0_i32_0 : i32, i32
  }
  func.func @transform_11(%arg0: i32) -> (i32, i32) {
    %c0_i32 = arith.constant 0 : i32
    %c0_i32_0 = arith.constant 0 : i32
    %c0_i32_1 = arith.constant 0 : i32
    return %c0_i32, %c0_i32_0 : i32, i32
  }
  func.func @transform_12(%arg0: i32) -> (i32, i32, i32) {
    %c0_i32 = arith.constant 0 : i32
    %c0_i32_0 = arith.constant 0 : i32
    %c0_i32_1 = arith.constant 0 : i32
    return %arg0, %c0_i32, %c0_i32_0 : i32, i32, i32
  }
}

</mosaic_0001>

<bundles_post_ra>
// kernel: tpu_custom_call.1
= control target key start
LH: loop header
LB: loop body
LE: loop exit
PB: predicated region body
PF: predicated region fallthrough
CT: control target
= control target key end

     0   :  { %s2301_s0 = inlined_call_operand.vmem [shape: f32[2,8,32], index: 0, kind: input, shape index: {}]   ;;  %s2302_s1 = inlined_call_operand.hbm [shape: f32[8,32], index: 1, kind: input, shape index: {}]   ;;  %s2303_s2 = inlined_call_operand.vmem [shape: bf16[32,96], index: 2, kind: input, shape index: {}]   ;;  %s2304_s3 = inlined_call_operand.vmem [shape: f32[1,96], index: 3, kind: input, shape index: {}]   ;;  %s2305_s4 = inlined_call_operand.vmem [shape: bf16[32,32], index: 4, kind: input, shape index: {}]   ;;  %s2306_s5 = inlined_call_operand.vmem [shape: f32[1,32], index: 5, kind: input, shape index: {}]   ;;  %s2307_s6 = inlined_call_operand.hbm [shape: bf16[32,64], index: 6, kind: input, shape index: {}]   ;;  %s2308_s7 = inlined_call_operand.vmem [shape: f32[1,64], index: 7, kind: input, shape index: {}]   ;;  %s2309_s8 = inlined_call_operand.vmem [shape: bf16[64,32], index: 8, kind: input, shape index: {}]   ;;  %s2310_s9 = inlined_call_operand.vmem [shape: f32[1,32], index: 9, kind: input, shape index: {}]   ;;  %s2311_s10 = inlined_call_operand.vmem [shape: f32[1,32], index: 10, kind: input, shape index: {}]   ;;  %s2312_s11 = inlined_call_operand.vmem [shape: f32[1,32], index: 11, kind: input, shape index: {}]   ;;  %s2313_s12 = inlined_call_operand.hbm [shape: f32[2,8,32], index: 12, kind: output, shape index: {}]  }
   0x1   :  { %2318 = sst [smem:[#allocation13_spill]] %s2301_s0 }
   0x2   :  { %17 = vsyncpa [#allocation3], 0 }
   0x3   :  { %18 = vsyncpa [#allocation6], 0 }
   0x4   :  { %19 = vsyncpa [#allocation4], 0 }
   0x5   :  { %21 = vsyncpa [#allocation4 + $0x1], 0  ;;  %s1916_s21 = smov 0   ;;  %s1918_s22 = smov 0  }
   0x6   :  { %s1920_s23 = smov 0   ;;  %s1922_s24 = smov 0  }
   0x7 LB: > { %2319 = sst [smem:[#allocation11_spill]] %s1832_s23  ;;  %s1937_s25 = sadd.s32 4294967295, %s1836_s24   ;;  %s1836_s24 = sphi %s1922_s24, %s2332_s24   ;;  %s1832_s23 = sphi %s1920_s23, %s2329_s23   ;;  %s1828_s22 = sphi %s1918_s22, %s2331_s22   ;;  %s1824_s21 = sphi %s1916_s21, %s2330_s21  }
   0x8   : > { %s1493_s26 = sadd.s32 4294967294, %s1836_s24   ;;  %s1941_s27 = sadd.s32 1, %s1836_s24  }
   0x9   : > { %s291_s28 = sadd.s32 1, %s1832_s23  ;;  %s288_s29 = ssub.s32 %s1836_s24, %s1941_s27 }
   0xa   : > { %p301_p0 = scmp.ne.s32.totalorder %s1832_s23, %s1828_s22  ;;  %p289_p1 = scmp.eq.s32.totalorder %s288_s29, 0 }
   0xb   : > { %p302_p2 = scmp.eq.s32.totalorder %s1937_s25, 1  ;;  %p307_p3 = scmp.ne.s32.totalorder %s1828_s22, %s1824_s21 }
   0xc   : > { %p308_p4 = scmp.eq.s32.totalorder %s1493_s26, 1  ;;  %p1494_p7 = scmp.ge.s32.totalorder %s1836_s24, 1 }
   0xd   : > { %s1952_s30 = scalar_select %p289_p1, %s1832_s23, %s291_s28  }
   0xe   : > { %p1954_p5 = por %p302_p2, %p301_p0  ;;  %p1958_p6 = por %p308_p4, %p307_p3 }
   0xf   : > { %2320 = sst [smem:[#allocation12_spill]] %s1952_s30  ;;  %p315_p8 = scmp.lt.s32.totalorder %s1836_s24, 3 }
  0x10   : > { %p1602_p9 = scmp.eq.s32.totalorder %s1937_s25, 0  ;;  %s327_s18 = sshll.u32 %s2302_s1, 4  ;;  %s328_s18 = int_to_ptr.hbm [resolvable:$true] %s327_s18 }
  0x11   : > { %p1965_p10 = pnand %p1494_p7, %p315_p8  ;;  %s1838_s19 = smov [#allocation2]  }
  0x12   : > { %s329_s20 = sshll.u32 %s1838_s19, 4  ;;  %s350_s29 = sshll.u32 %s2307_s6, 4  ;;  %s330_s20 = int_to_ptr.vmem [resolvable:$true] %s329_s20  ;;  %s351_s29 = int_to_ptr.hbm [resolvable:$true] %s350_s29 }
  0x13   : > { %p1591_p11 = pneg %p1965_p10  ;;  %s1839_s30 = smov [#allocation5]  }
  0x14   : > { %s352_s23 = sshll.u32 %s1839_s30, 4  ;;  %s1840_s16 = smov 64   ;;  %s353_s23 = int_to_ptr.vmem [resolvable:$true] %s352_s23 }
  0x15   : > { %p1592_p12 = pnand %p1602_p9, %p1591_p11  ;;  %s1841_s17 = smov 4  }
  0x16   : > { %390 = sbr.rel (%p1965_p10) target bundleno = 4512 (0x11a0), region = 68 }
  0x17   : > { %1594 = dma.hbm_to_vmem [thread:$0]  (!%p1592_p12), %s328_s18, 128, %s330_s20, [#allocation3]  }
  0x18   : > { %1597 = dma.hbm_to_vmem [thread:$0]  (!%p1592_p12), %s351_s29, 256, %s353_s23, [#allocation6], %s1840_s16, %s1840_s16, %s1841_s17  }
  0x1b   : > { %1811 = dma.done.wait (%p1602_p9), [#allocation3], 128  }
  0x1c   : > { %1813 = vsyncadd (%p1602_p9), [#allocation3], 4294967168 }
  0x1d   : > { %1815 = dma.done.wait (%p1602_p9), [#allocation6], 256  }
  0x1e   : > { %1817 = vsyncadd (%p1602_p9), [#allocation6], 4294967040  ;;  %p437_p13 = scmp.lt.s32.totalorder %s1937_s25, 1  ;;  %s2324_s0 = sld [smem:[#allocation13_spill]]  ;;  %v476_v1 = vld [vmem:[#allocation2] sm:$0xff]  ;;  %vm478_vm0 = vcmask 261120  }
  0x1f   : > { %v1842_v5 = vmov 32.0   ;;  %v2002_v17 = vld [vmem:[%s2303_s2 + $0x8] sm:$0xff]  ;;  %v2008_v18 = vld [vmem:[%s2303_s2] sm:$0xff]  ;;  %s1844_s20 = smov 120   ;;  %s1845_s26 = smov 112   ;;  %vm576_vm5 = vcmask 64512  }
  0x20   : > { %s438_s30 = scalar_select %p437_p13, %s1937_s25, 1  ;;  %1658 = vrcp.f32 %v1842_v5  ;;  %535 = vmatpush.bf16.msra.mxu0 %v2002_v17  ;;  %v2015_v28 = vld [vmem:[%s2311_s10] ss:$0 sm:$0xff]  ;;  %vm721_vm6 = vcmask 1043456   ;;  %vm814_vm7 = vcmask 130048   ;;  %vm816_vm8 = vcmask 195584  }
  0x21   : > { %v2020_v31 = vld [vmem:[%s2312_s11] ss:$0 sm:$0xff]  ;;  %s1846_s28 = smov 96   ;;  %s1847_s29 = smov 64   ;;  %vm937_vm12 = vcmask 523264  }
  0x22   : > { %s1502_s23 = sshll.u32 %s438_s30, 3  ;;  %v2032_v35 = vld [vmem:[%s2304_s3] ss:$0 sm:$0xff]  ;;  %s2315_s16 = smov 8  }
  0x23   : > { %s2316_s17 = smov 24   ;;  %s2317_s30 = smov 16  }
  0x24   : > { %s440_s19 = scalar_lea.vmem %s2324_s0, %s1502_s23  ;;  %536 = vmatpush.bf16.msra.mxu0 %v2008_v18 }
  0x25   : > { %v474_v0 = vld [vmem:[%s440_s19] sm:$0xff]  ;;  %s1843_s19 = smov 104  }
  0x26   : > { %v475_v2 = vmul.f32 5.656854, %v474_v0  ;;  %v1659_v6 = vpop.eup %1658 }
  0x27   : > { %v483_v7 = vmul.f32 32.0, %v1659_v6  ;;  %vm487_vm1 = vweird.f32 %v1659_v6 }
  0x28   : > { %v477_v3 = vadd.f32 %v476_v1, %v475_v2 }
  0x29   : > { %v484_v8 = vsub.f32 1.0, %v483_v7 }
  0x2a   : > { %v479_v4 = vsel %vm478_vm0, %v477_v3, 0.0 }
  0x2b   : > { %480 = vadd.xlane.f32.xlu0 %v479_v4  ;;  %v485_v9 = vmul.f32 %v1659_v6, %v484_v8 }
  0x2d   : > { %v486_v10 = vadd.f32 %v1659_v6, %v485_v9 }
  0x2f   : > { %v1995_v11 = vsel %vm487_vm1, %v1659_v6, %v486_v10 }
  0x9e   : > { %v481_v12 = vpop.xlane.xlu0 %480 }
  0x9f   : > { %v489_v13 = vmul.f32 %v1995_v11, %v481_v12 }
  0xa1   : > { %v490_v14 = vsub.f32 %v477_v3, %v489_v13 }
  0xa3   : > { %v491_v15 = vmul.f32 %v490_v14, %v490_v14 }
  0xa5   : > { %v492_v16 = vsel %vm478_vm0, %v491_v15, 0.0 }
  0xa6   : > { %493 = vadd.xlane.f32.xlu0 %v492_v16 }
 0x119   : > { %v494_v19 = vpop.xlane.xlu0 %493 }
 0x11a   : > { %v495_v20 = vmul.f32 %v494_v19, %v1995_v11 }
 0x11c   : > { %v496_v21 = vadd.f32 1e-05, %v495_v20 }
 0x11e   : > { %1660 = vrsqrt.f32 %v496_v21  ;;  %vm503_vm3 = vweird.f32 %v496_v21 }
 0x124   : > { %v1661_v22 = vpop.eup %1660 }
 0x125   : > { %v498_v23 = vmul.f32 %v1661_v22, %v496_v21  ;;  %vm504_vm2 = vweird.f32 %v1661_v22 }
 0x126   : > { %vm505_vm4 = vmor %vm503_vm3, %vm504_vm2 }
 0x127   : > { %v499_v24 = vmul.f32 %v1661_v22, %v498_v23 }
 0x129   : > { %v500_v25 = vmul.f32 0.5, %v499_v24 }
 0x12b   : > { %v501_v26 = vsub.f32 1.5, %v500_v25 }
 0x12d   : > { %v502_v27 = vmul.f32 %v1661_v22, %v501_v26 }
 0x12f   : > { %v506_v29 = vsel %vm505_vm4, %v1661_v22, %v502_v27 }
 0x130   : > { %v507_v30 = vmul.f32 %v506_v29, %v490_v14 }
 0x132   : > { %v508_v32 = vmul.f32 %v2015_v28, %v507_v30 }
 0x134   : > { %v2024_v33 = vadd.f32 %v2020_v31, %v508_v32 }
 0x136   : > { %v510_v34 = vpack.c.bf16 %v2024_v33, %v2024_v33 }
 0x138   : > { %1511 = vmatmul.msk.bf16.vlgmr.msra.gmra.mxu0 %vm478_vm0, %v510_v34 }
 0x1b5   : > { %v538_v36 = vpop.f32.mrf.mxu0 }
 0x1b6   : > { %v539_v37 = vadd.f32 %v2032_v35, %v538_v36 }
 0x1b8   : > { %564 = vrot.lane.b32.xlu2 %v539_v37, %s1843_s19  ;;  %558 = vrot.lane.b32.xlu1 %v539_v37, %s1844_s20  ;;  %v542_v39 = vmul.f32 0.35355338, %v539_v37  ;;  %v567_v44 = vpack.c.bf16 %v539_v37, %v539_v37 }
 0x1ba   : > { %v572_v45 = vunpack.c.l.b16 %v567_v44  ;;  %v553_v0 = vpack.c.bf16 %v542_v39, %v542_v39 }
 0x1bc   : > { %v2043_v46 = vpack.c.b16 %v572_v45, %v572_v45 }
 0x1bd   : > { %v540_v38 = vpop.f32.mrf.mxu0 }
 0x1c0   : > { %561 = vrot.lane.b32.xlu1 %v539_v37, %s1845_s26 }
 0x1c8   : > { %544 = vrot.lane.b32.xlu1 %v542_v39, %s1844_s20 }
 0x212   : > { %v565_v40 = vpop.permute.xlu2 %564 }
 0x213   : > { %v570_v41 = vpack.c.bf16 %v565_v40, %v565_v40 }
 0x215   : > { %v645_v42 = vunpack.c.l.b16 %v570_v41 }
 0x217   : > { %v2039_v43 = vpack.c.b16 %v645_v42, %v645_v42 }
 0x219   : > { %647 = vrot.lane.b32.xlu1 %v2039_v43, %s1846_s28 }
 0x221   : > { %574 = vrot.lane.b32.xlu1 %v2043_v46, %s1846_s28 }
 0x22a   : > { %v559_v47 = vpop.permute.xlu1 %558 }
 0x22b   : > { %v568_v48 = vpack.c.bf16 %v559_v47, %v559_v47 }
 0x22d   : > { %v597_v49 = vunpack.c.l.b16 %v568_v48 }
 0x22f   : > { %v2047_v50 = vpack.c.b16 %v597_v49, %v597_v49 }
 0x231   : > { %599 = vrot.lane.b32.xlu2 %v2047_v50, %s1846_s28 }
 0x232   : > { %v562_v51 = vpop.permute.xlu1 %561 }
 0x233   : > { %v569_v52 = vpack.c.bf16 %v562_v51, %v562_v51 }
 0x235   : > { %v621_v53 = vunpack.c.l.b16 %v569_v52 }
 0x237   : > { %v2051_v54 = vpack.c.b16 %v621_v53, %v621_v53 }
 0x239   : > { %623 = vrot.lane.b32.xlu0 %v2051_v54, %s1846_s28  ;;  %547 = vrot.lane.b32.xlu2 %v542_v39, %s1845_s26 }
 0x23a   : > { %v545_v55 = vpop.permute.xlu1 %544 }
 0x23b   : > { %v554_v60 = vpack.c.bf16 %v545_v55, %v545_v55 }
 0x241   : > { %550 = vrot.lane.b32.xlu2 %v542_v39, %s1843_s19 }
 0x28b   : > { %v600_v56 = vpop.permute.xlu2 %599  ;;  %v648_v57 = vpop.permute.xlu1 %647 }
 0x28c   : > { %v605_v58 = vsel %vm576_vm5, %v600_v56, 0  ;;  %v653_v59 = vsel %vm576_vm5, %v648_v57, 0 }
 0x28d   : > { %614 = vmatpush.bf16.xpose.msra.mxu2 %v605_v58  ;;  %662 = vmatpush.bf16.xpose.msrb.mxu0 %v653_v59 }
 0x293   : > { %v548_v61 = vpop.permute.xlu2 %547  ;;  %v575_v62 = vpop.permute.xlu1 %574 }
 0x294   : > { %1513 = vmatmul.msk.bf16.vlgmr.msra.gmra.mxu2 %vm576_vm5, %v554_v60  ;;  %v581_v63 = vsel %vm576_vm5, %v575_v62, 0  ;;  %v555_v5 = vpack.c.bf16 %v548_v61, %v548_v61 }
 0x295   : > { %590 = vmatpush.bf16.xpose.msra.mxu1 %v581_v63 }
 0x29b   : > { %v551_v1 = vpop.permute.xlu2 %550 }
 0x29c   : > { %v556_v2 = vpack.c.bf16 %v551_v1, %v551_v1  ;;  %1512 = vmatmul.msk.bf16.vlgmr.msra.gmra.mxu1 %vm576_vm5, %v553_v0 }
 0x29e   : > { %1515 = vmatmul.msk.bf16.vlgmr.msrb.gmra.mxu0 %vm576_vm5, %v556_v2 }
 0x2ab   : > { %v624_v3 = vpop.permute.xlu0 %623 }
 0x2ac   : > { %v629_v4 = vsel %vm576_vm5, %v624_v3, 0 }
 0x2ad   : > { %638 = vmatpush.bf16.xpose.msra.mxu3 %v629_v4 }
 0x2b4   : > { %1514 = vmatmul.msk.bf16.vlgmr.msra.gmra.mxu3 %vm576_vm5, %v555_v5 }
 0x317   : > { %v616_v6 = vpop.f32.mrf.mxu2 }
 0x318   : > { %v671_v7 = vsel %vm576_vm5, %v616_v6, -inf }
 0x319   : > { %672 = vmax.xlane.f32.xlu2 %v671_v7  ;;  %v592_v8 = vpop.f32.mrf.mxu1 }
 0x31a   : > { %v668_v13 = vsel %vm576_vm5, %v592_v8, -inf }
 0x31b   : > { %v664_v9 = vpop.f32.mrf.mxu0 }
 0x31c   : > { %v677_v10 = vsel %vm576_vm5, %v664_v9, -inf }
 0x31d   : > { %678 = vmax.xlane.f32.xlu1 %v677_v10 }
 0x31f   : > { %v618_v12 = vpop.f32.mrf.mxu2 }
 0x320   : > { %v2097_v12 = vld [vmem:[%s2305_s4 + $0x8] sm:$0xff] }
 0x321   : > { %669 = vmax.xlane.f32.xlu2 %v668_v13  ;;  %v594_v14 = vpop.f32.mrf.mxu1  ;;  %v2103_v13 = vld [vmem:[%s2305_s4] sm:$0xff] }
 0x323   : > { %v666_v15 = vpop.f32.mrf.mxu0 }
 0x337   : > { %v640_v16 = vpop.f32.mrf.mxu3 }
 0x338   : > { %v674_v19 = vsel %vm576_vm5, %v640_v16, -inf }
 0x339   : > { %675 = vmax.xlane.f32.xlu0 %v674_v19 }
 0x33f   : > { %v642_v20 = vpop.f32.mrf.mxu3 }
 0x38c   : > { %v673_v21 = vpop.xlane.xlu2 %672 }
 0x38d   : > { %v681_v22 = vsub.f32 %v616_v6, %v673_v21 }
 0x38f   : > { %v686_v23 = vmul.f32 1.442695, %v681_v22 }
 0x390   : > { %v679_v24 = vpop.xlane.xlu1 %678 }
 0x391   : > { %1662 = vpow2.f32 %v686_v23  ;;  %v683_v25 = vsub.f32 %v664_v9, %v679_v24  ;;  %v2113_v23 = vld [vmem:[%s2306_s5] ss:$0 sm:$0xff] }
 0x393   : > { %v690_v26 = vmul.f32 1.442695, %v683_v25 }
 0x394   : > { %v670_v40 = vpop.xlane.xlu2 %669 }
 0x395   : > { %1664 = vpow2.f32 %v690_v26  ;;  %v680_v41 = vsub.f32 %v592_v8, %v670_v40 }
 0x397   : > { %v1663_v27 = vpop.eup %1662  ;;  %v684_v42 = vmul.f32 1.442695, %v680_v41 }
 0x398   : > { %v695_v29 = vsel %vm576_vm5, %v1663_v27, 0.0 }
 0x399   : > { %696 = vadd.xlane.f32.xlu0 %v695_v29 }
 0x39b   : > { %v1665_v30 = vpop.eup %1664 }
 0x39c   : > { %v701_v32 = vsel %vm576_vm5, %v1665_v30, 0.0 }
 0x39d   : > { %702 = vadd.xlane.f32.xlu1 %v701_v32 }
 0x3ac   : > { %v676_v34 = vpop.xlane.xlu0 %675 }
 0x3ad   : > { %v682_v36 = vsub.f32 %v640_v16, %v676_v34  ;;  %738 = vrot.lane.b32.xlu0 %v2047_v50, %s1847_s29 }
 0x3af   : > { %v688_v37 = vmul.f32 1.442695, %v682_v36 }
 0x3b1   : > { %1666 = vpow2.f32 %v688_v37 }
 0x3b2   : > { %1668 = vpow2.f32 %v684_v42  ;;  %v2136_v42 = vld [vmem:[%s2309_s8 + $0x10] sm:$0xff] }
 0x3b6   : > { %780 = vrot.lane.b32.xlu1 %v2039_v43, %s1847_s29 }
 0x3b7   : > { %v1667_v38 = vpop.eup %1666 }
 0x3b8   : > { %v698_v39 = vsel %vm576_vm5, %v1667_v38, 0.0  ;;  %v1669_v44 = vpop.eup %1668 }
 0x3b9   : > { %699 = vadd.xlane.f32.xlu2 %v698_v39  ;;  %v692_v45 = vsel %vm576_vm5, %v1669_v44, 0.0  ;;  %v2123_v39 = vld [vmem:[#allocation5] sm:$0xff] }
 0x3d1   : > { %759 = vrot.lane.b32.xlu2 %v2051_v54, %s1847_s29 }
 0x3d7   : > { %693 = vadd.xlane.f32.xlu0 %v692_v45 }
 0x3d9   : > { %716 = vrot.lane.b32.xlu2 %v2043_v46, %s1847_s29 }
 0x40c   : > { %v697_v47 = vpop.xlane.xlu0 %696 }
 0x40d   : > { %1670 = vrcp.f32 %v697_v47 }
 0x410   : > { %v703_v48 = vpop.xlane.xlu1 %702 }
 0x411   : > { %1672 = vrcp.f32 %v703_v48 }
 0x413   : > { %v1671_v43 = vpop.eup %1670 }
 0x414   : > { %v709_v49 = vmul.f32 %v1671_v43, %v1663_v27 }
 0x416   : > { %v713_v52 = vpack.c.bf16 %v709_v49, %v709_v49 }
 0x417   : > { %v1673_v53 = vpop.eup %1672 }
 0x418   : > { %v711_v54 = vmul.f32 %v1673_v53, %v1665_v30 }
 0x41a   : > { %v715_v46 = vpack.c.bf16 %v711_v54, %v711_v54 }
 0x41f   : > { %v739_v50 = vpop.permute.xlu0 %738 }
 0x420   : > { %v744_v51 = vsel %vm721_vm6, %v739_v50, 0 }
 0x421   : > { %753 = vmatpush.bf16.msrb.mxu2 %v744_v51 }
 0x424   : > { %1517 = vmatmul.msk.bf16.vlgmr.msrb.gmra.mxu2 %vm576_vm5, %v713_v52 }
 0x428   : > { %v781_v55 = vpop.permute.xlu1 %780 }
 0x429   : > { %v786_v56 = vsel %vm721_vm6, %v781_v55, 0 }
 0x42a   : > { %795 = vmatpush.bf16.msra.mxu0 %v786_v56  ;;  %v2145_v56 = vld [vmem:[%s2309_s8 + $0x8] sm:$0xff] }
 0x42c   : > { %v700_v57 = vpop.xlane.xlu2 %699 }
 0x42d   : > { %1674 = vrcp.f32 %v700_v57  ;;  %1519 = vmatmul.msk.bf16.vlgmr.msra.gmra.mxu0 %vm576_vm5, %v715_v46  ;;  %v2151_v46 = vld [vmem:[%s2309_s8] sm:$0xff] }
 0x42e   : > { %1013 = vmatpush.bf16.msrb.mxu0 %v2002_v17  ;;  %v2157_v57 = vld [vmem:[%s2308_s7] ss:$0 sm:$0xff] }
 0x432   : > { %1014 = vmatpush.bf16.msrb.mxu0 %v2008_v18 }
 0x433   : > { %v1675_v58 = vpop.eup %1674 }
 0x434   : > { %v710_v59 = vmul.f32 %v1675_v58, %v1667_v38  ;;  %v760_v60 = vpop.permute.xlu2 %759  ;;  %v2120_v38 = vld [vmem:[#allocation5 + $0x8] sm:$0xff] }
 0x435   : > { %v765_v61 = vsel %vm721_vm6, %v760_v60, 0  ;;  %900 = vmatpush.bf16.msra.mxu2 %v2120_v38 }
 0x436   : > { %774 = vmatpush.bf16.msrb.mxu3 %v765_v61  ;;  %v714_v62 = vpack.c.bf16 %v710_v59, %v710_v59 }
 0x439   : > { %1518 = vmatmul.msk.bf16.vlgmr.msrb.gmra.mxu3 %vm576_vm5, %v714_v62  ;;  %901 = vmatpush.bf16.msra.mxu2 %v2123_v39 }
 0x43c   : > { %v717_v63 = vpop.permute.xlu2 %716 }
 0x43d   : > { %v723_v0 = vsel %vm721_vm6, %v717_v63, 0 }
 0x43e   : > { %732 = vmatpush.bf16.msrb.mxu1 %v723_v0  ;;  %v2164_v0 = vld [vmem:[%s2310_s9] ss:$0 sm:$0xff] }
 0x442   : > { %843 = vmatpush.bf16.msra.mxu1 %v2097_v12 }
 0x446   : > { %844 = vmatpush.bf16.msra.mxu1 %v2103_v13 }
 0x44a   : > { %v694_v17 = vpop.xlane.xlu0 %693 }
 0x44b   : > { %1676 = vrcp.f32 %v694_v17 }
 0x451   : > { %v1677_v1 = vpop.eup %1676 }
 0x452   : > { %v708_v2 = vmul.f32 %v1677_v1, %v1669_v44 }
 0x454   : > { %v712_v3 = vpack.c.bf16 %v708_v2, %v708_v2 }
 0x456   : > { %1516 = vmatmul.msk.bf16.vlgmr.msrb.gmra.mxu1 %vm576_vm5, %v712_v3 }
 0x4a7   : > { %v755_v18 = vpop.f32.mrf.mxu2 }
 0x4a8   : > { %802 = vrot.lane.b32.xlu1 %v755_v18, %s2315_s16 }
 0x4aa   : > { %v797_v4 = vpop.f32.mrf.mxu0 }
 0x4af   : > { %v757_v5 = vpop.f32.mrf.mxu2 }
 0x4b0   : > { %810 = vrot.lane.b32.xlu1 %v797_v4, %s2316_s17  ;;  %s1568_s17 = sshll.u32 %s1937_s25, 3 }
 0x4b1   : > { %s1407_s16 = scalar_lea.hbm %s2313_s12, %s1568_s17 }
 0x4b2   : > { %v799_v6 = vpop.f32.mrf.mxu0 }
 0x4bc   : > { %v776_v7 = vpop.f32.mrf.mxu3 }
 0x4bd   : > { %806 = vrot.lane.b32.xlu2 %v776_v7, %s2317_s30 }
 0x4c4   : > { %v778_v8 = vpop.f32.mrf.mxu3 }
 0x4d3   : > { %v734_v9 = vpop.f32.mrf.mxu1 }
 0x4db   : > { %v736_v10 = vpop.f32.mrf.mxu1 }
 0x517   : > { %v807_v16 = vpop.permute.xlu2 %806 }
 0x51a   : > { %v803_v14 = vpop.permute.xlu1 %802 }
 0x51b   : > { %v813_v15 = vsel %vm576_vm5, %v734_v9, %v803_v14 }
 0x51c   : > { %v815_v20 = vsel %vm814_vm7, %v813_v15, %v807_v16 }
 0x522   : > { %v811_v19 = vpop.permute.xlu1 %810 }
 0x523   : > { %v817_v21 = vsel %vm816_vm8, %v815_v20, %v811_v19 }
 0x524   : > { %v818_v22 = vpack.c.bf16 %v817_v21, %v817_v21 }
 0x526   : > { %1528 = vmatmul.msk.bf16.vlgmr.msra.gmra.mxu1 %vm478_vm0, %v818_v22 }
 0x5a3   : > { %v846_v24 = vpop.f32.mrf.mxu1 }
 0x5a4   : > { %v847_v25 = vadd.f32 %v2113_v23, %v846_v24 }
 0x5a6   : > { %v850_v26 = vadd.f32 %v847_v25, %v2024_v33  ;;  %v2129_v33 = vld [vmem:[%s2309_s8 + $0x18] sm:$0xff] }
 0x5a7   : > { %945 = vmatpush.bf16.msra.mxu3 %v2129_v33 }
 0x5a8   : > { %v851_v27 = vsel %vm478_vm0, %v850_v26, 0.0 }
 0x5a9   : > { %852 = vadd.xlane.f32.xlu2 %v851_v27 }
 0x5ab   : > { %v848_v29 = vpop.f32.mrf.mxu1  ;;  %946 = vmatpush.bf16.msra.mxu3 %v2136_v42 }
 0x5af   : > { %947 = vmatpush.bf16.msra.mxu3 %v2145_v56 }
 0x5b3   : > { %948 = vmatpush.bf16.msra.mxu3 %v2151_v46 }
 0x61c   : > { %v853_v30 = vpop.xlane.xlu2 %852 }
 0x61d   : > { %v854_v32 = vmul.f32 %v853_v30, %v1995_v11 }
 0x61f   : > { %v855_v34 = vsub.f32 %v850_v26, %v854_v32 }
 0x621   : > { %v856_v36 = vmul.f32 %v855_v34, %v855_v34 }
 0x623   : > { %v857_v37 = vsel %vm478_vm0, %v856_v36, 0.0 }
 0x624   : > { %858 = vadd.xlane.f32.xlu1 %v857_v37 }
 0x697   : > { %v859_v40 = vpop.xlane.xlu1 %858 }
 0x698   : > { %v860_v41 = vmul.f32 %v859_v40, %v1995_v11 }
 0x69a   : > { %v861_v44 = vadd.f32 1e-05, %v860_v41 }
 0x69c   : > { %1678 = vrsqrt.f32 %v861_v44  ;;  %vm868_vm10 = vweird.f32 %v861_v44 }
 0x6a2   : > { %v1679_v45 = vpop.eup %1678 }
 0x6a3   : > { %v863_v47 = vmul.f32 %v1679_v45, %v861_v44  ;;  %vm869_vm9 = vweird.f32 %v1679_v45 }
 0x6a4   : > { %vm870_vm11 = vmor %vm868_vm10, %vm869_vm9 }
 0x6a5   : > { %v864_v43 = vmul.f32 %v1679_v45, %v863_v47 }
 0x6a7   : > { %v865_v48 = vmul.f32 0.5, %v864_v43 }
 0x6a9   : > { %v866_v49 = vsub.f32 1.5, %v865_v48 }
 0x6ab   : > { %v867_v50 = vmul.f32 %v1679_v45, %v866_v49 }
 0x6ad   : > { %v871_v51 = vsel %vm870_vm11, %v1679_v45, %v867_v50 }
 0x6ae   : > { %v872_v52 = vmul.f32 %v871_v51, %v855_v34 }
 0x6b0   : > { %v873_v53 = vmul.f32 %v2015_v28, %v872_v52 }
 0x6b2   : > { %v874_v54 = vadd.f32 %v2020_v31, %v873_v53 }
 0x6b4   : > { %v875_v55 = vpack.c.bf16 %v874_v54, %v874_v54 }
 0x6b6   : > { %1537 = vmatmul.msk.bf16.vlgmr.msra.gmra.mxu2 %vm478_vm0, %v875_v55 }
 0x739   : > { %v903_v58 = vpop.f32.mrf.mxu2 }
 0x73a   : > { %v904_v59 = vadd.f32 %v2157_v57, %v903_v58 }
 0x73c   : > { %v907_v60 = vmax.f32 %v904_v59, 0.0 }
 0x73e   : > { %v908_v61 = vmul.f32 %v907_v60, %v907_v60 }
 0x740   : > { %v909_v62 = vpack.c.bf16 %v908_v61, %v908_v61 }
 0x741   : > { %v905_v63 = vpop.f32.mrf.mxu2 }
 0x742   : > { %1554 = vmatmul.msk.bf16.vlgmr.msra.gmra.mxu3 %vm937_vm12, %v909_v62 }
 0x7c5   : > { %v950_v17 = vpop.f32.mrf.mxu3 }
 0x7c6   : > { %v951_v1 = vadd.f32 %v2164_v0, %v950_v17 }
 0x7c8   : > { %v954_v2 = vadd.f32 %v951_v1, %v874_v54 }
 0x7ca   : > { %v955_v3 = vsel %vm478_vm0, %v954_v2, 0.0 }
 0x7cb   : > { %956 = vadd.xlane.f32.xlu0 %v955_v3 }
 0x7cd   : > { %v952_v18 = vpop.f32.mrf.mxu3 }
 0x83e   : > { %v957_v4 = vpop.xlane.xlu0 %956 }
 0x83f   : > { %v958_v5 = vmul.f32 %v957_v4, %v1995_v11 }
 0x841   : > { %v959_v6 = vsub.f32 %v954_v2, %v958_v5 }
 0x843   : > { %v960_v7 = vmul.f32 %v959_v6, %v959_v6 }
 0x845   : > { %v961_v8 = vsel %vm478_vm0, %v960_v7, 0.0 }
 0x846   : > { %962 = vadd.xlane.f32.xlu0 %v961_v8 }
 0x8b9   : > { %v963_v9 = vpop.xlane.xlu0 %962 }
 0x8ba   : > { %v964_v10 = vmul.f32 %v963_v9, %v1995_v11 }
 0x8bc   : > { %v965_v14 = vadd.f32 1e-05, %v964_v10 }
 0x8be   : > { %1680 = vrsqrt.f32 %v965_v14  ;;  %vm972_vm14 = vweird.f32 %v965_v14 }
 0x8c4   : > { %v1681_v15 = vpop.eup %1680 }
 0x8c5   : > { %v967_v16 = vmul.f32 %v1681_v15, %v965_v14  ;;  %vm973_vm13 = vweird.f32 %v1681_v15 }
 0x8c6   : > { %vm974_vm15 = vmor %vm972_vm14, %vm973_vm13 }
 0x8c7   : > { %v968_v19 = vmul.f32 %v1681_v15, %v967_v16 }
 0x8c9   : > { %v969_v20 = vmul.f32 0.5, %v968_v19 }
 0x8cb   : > { %v970_v21 = vsub.f32 1.5, %v969_v20 }
 0x8cd   : > { %v971_v22 = vmul.f32 %v1681_v15, %v970_v21 }
 0x8cf   : > { %v975_v24 = vsel %vm974_vm15, %v1681_v15, %v971_v22 }
 0x8d0   : > { %v976_v25 = vmul.f32 %v975_v24, %v959_v6 }
 0x8d2   : > { %v977_v26 = vmul.f32 %v2015_v28, %v976_v25 }
 0x8d4   : > { %v978_v27 = vadd.f32 %v2020_v31, %v977_v26 }
 0x8d6   : > { %v979_v29 = vsel %vm478_vm0, %v978_v27, 0.0 }
 0x8d7   : > { %980 = vadd.xlane.f32.xlu0 %v979_v29 }
 0x94a   : > { %v981_v30 = vpop.xlane.xlu0 %980 }
 0x94b   : > { %v982_v32 = vmul.f32 %v981_v30, %v1995_v11 }
 0x94d   : > { %v983_v34 = vsub.f32 %v978_v27, %v982_v32 }
 0x94f   : > { %v984_v36 = vmul.f32 %v983_v34, %v983_v34 }
 0x951   : > { %v985_v37 = vsel %vm478_vm0, %v984_v36, 0.0 }
 0x952   : > { %986 = vadd.xlane.f32.xlu2 %v985_v37 }
 0x9c5   : > { %v987_v40 = vpop.xlane.xlu2 %986 }
 0x9c6   : > { %v988_v41 = vmul.f32 %v987_v40, %v1995_v11 }
 0x9c8   : > { %v989_v44 = vadd.f32 1e-05, %v988_v41 }
 0x9ca   : > { %1682 = vrsqrt.f32 %v989_v44  ;;  %vm996_vm2 = vweird.f32 %v989_v44 }
 0x9d0   : > { %v1683_v45 = vpop.eup %1682 }
 0x9d1   : > { %v991_v47 = vmul.f32 %v1683_v45, %v989_v44  ;;  %vm997_vm1 = vweird.f32 %v1683_v45 }
 0x9d2   : > { %vm998_vm3 = vmor %vm996_vm2, %vm997_vm1 }
 0x9d3   : > { %v992_v43 = vmul.f32 %v1683_v45, %v991_v47 }
 0x9d5   : > { %v993_v48 = vmul.f32 0.5, %v992_v43 }
 0x9d7   : > { %v994_v49 = vsub.f32 1.5, %v993_v48 }
 0x9d9   : > { %v995_v50 = vmul.f32 %v1683_v45, %v994_v49 }
 0x9db   : > { %v999_v51 = vsel %vm998_vm3, %v1683_v45, %v995_v50 }
 0x9dc   : > { %v1000_v52 = vmul.f32 %v999_v51, %v983_v34 }
 0x9de   : > { %v1001_v53 = vmul.f32 %v2015_v28, %v1000_v52 }
 0x9e0   : > { %v2179_v54 = vadd.f32 %v2020_v31, %v1001_v53 }
 0x9e2   : > { %v1003_v55 = vpack.c.bf16 %v2179_v54, %v2179_v54 }
 0x9e4   : > { %1555 = vmatmul.msk.bf16.vlgmr.msrb.gmra.mxu0 %vm478_vm0, %v1003_v55 }
 0xa61   : > { %v1016_v58 = vpop.f32.mrf.mxu0 }
 0xa62   : > { %v1017_v59 = vadd.f32 %v2032_v35, %v1016_v58 }
 0xa64   : > { %1042 = vrot.lane.b32.xlu2 %v1017_v59, %s1843_s19  ;;  %1039 = vrot.lane.b32.xlu1 %v1017_v59, %s1845_s26  ;;  %v1020_v61 = vmul.f32 0.35355338, %v1017_v59  ;;  %v1045_v62 = vpack.c.bf16 %v1017_v59, %v1017_v59 }
 0xa65   : > { %1036 = vrot.lane.b32.xlu0 %v1017_v59, %s1844_s20 }
 0xa66   : > { %v1050_v63 = vunpack.c.l.b16 %v1045_v62  ;;  %v1031_v18 = vpack.c.bf16 %v1020_v61, %v1020_v61 }
 0xa68   : > { %v2189_v17 = vpack.c.b16 %v1050_v63, %v1050_v63 }
 0xa69   : > { %v1018_v60 = vpop.f32.mrf.mxu0 }
 0xa6c   : > { %1025 = vrot.lane.b32.xlu2 %v1020_v61, %s1845_s26  ;;  %s2327_s26 = smov 24  }
 0xa74   : > { %1052 = vrot.lane.b32.xlu2 %v2189_v17, %s1846_s28 }
 0xabe   : > { %v1043_v1 = vpop.permute.xlu2 %1042 }
 0xabf   : > { %v1048_v10 = vpack.c.bf16 %v1043_v1, %v1043_v1 }
 0xac1   : > { %v1122_v16 = vunpack.c.l.b16 %v1048_v10 }
 0xac3   : > { %v1123_v19 = vpack.c.b16 %v1122_v16, %v1122_v16 }
 0xac6   : > { %v1026_v2 = vpop.permute.xlu2 %1025 }
 0xac7   : > { %v1033_v26 = vpack.c.bf16 %v1026_v2, %v1026_v2 }
 0xace   : > { %v1053_v35 = vpop.permute.xlu2 %1052 }
 0xacf   : > { %v1058_v3 = vsel %vm576_vm5, %v1053_v35, 0 }
 0xad0   : > { %1067 = vmatpush.bf16.xpose.msrb.mxu1 %v1058_v3 }
 0xad6   : > { %v1040_v4 = vpop.permute.xlu1 %1039 }
 0xad7   : > { %v1047_v5 = vpack.c.bf16 %v1040_v4, %v1040_v4  ;;  %v1037_v6 = vpop.permute.xlu0 %1036  ;;  %1556 = vmatmul.msk.bf16.vlgmr.msrb.gmra.mxu1 %vm576_vm5, %v1031_v18 }
 0xad8   : > { %v1046_v7 = vpack.c.bf16 %v1037_v6, %v1037_v6 }
 0xad9   : > { %v1098_v8 = vunpack.c.l.b16 %v1047_v5 }
 0xada   : > { %v1074_v9 = vunpack.c.l.b16 %v1046_v7 }
 0xadb   : > { %v2195_v14 = vpack.c.b16 %v1098_v8, %v1098_v8 }
 0xadc   : > { %v1075_v15 = vpack.c.b16 %v1074_v9, %v1074_v9 }
 0xadd   : > { %1100 = vrot.lane.b32.xlu1 %v2195_v14, %s1846_s28 }
 0xade   : > { %1076 = vrot.lane.b32.xlu0 %v1075_v15, %s1846_s28 }
 0xae5   : > { %1124 = vrot.lane.b32.xlu1 %v1123_v19, %s1846_s28  ;;  %s434_s28 = sand.u32 1, %s1828_s22  }
 0xae6   : > { %1022 = vrot.lane.b32.xlu0 %v1020_v61, %s1844_s20  ;;  %s2326_s20 = smov 8   ;;  %s1397_s17 = scalar_lea.sflag [#allocation4], %s434_s28 }
 0xaee   : > { %1028 = vrot.lane.b32.xlu0 %v1020_v61, %s1843_s19  ;;  %s2325_s19 = smov 16  }
 0xb4f   : > { %v1101_v20 = vpop.permute.xlu1 %1100 }
 0xb50   : > { %v1106_v21 = vsel %vm576_vm5, %v1101_v20, 0  ;;  %v1077_v22 = vpop.permute.xlu0 %1076 }
 0xb51   : > { %v1082_v24 = vsel %vm576_vm5, %v1077_v22, 0  ;;  %1115 = vmatpush.bf16.xpose.msrb.mxu3 %v1106_v21 }
 0xb52   : > { %1091 = vmatpush.bf16.xpose.msrb.mxu2 %v1082_v24 }
 0xb54   : > { %v1069_v25 = vpop.f32.mrf.mxu1 }
 0xb55   : > { %v1145_v50 = vsel %vm576_vm5, %v1069_v25, -inf }
 0xb57   : > { %v1125_v27 = vpop.permute.xlu1 %1124 }
 0xb58   : > { %v1130_v29 = vsel %vm576_vm5, %v1125_v27, 0  ;;  %v1023_v30 = vpop.permute.xlu0 %1022  ;;  %1558 = vmatmul.msk.bf16.vlgmr.msrb.gmra.mxu3 %vm576_vm5, %v1033_v26 }
 0xb59   : > { %v1032_v32 = vpack.c.bf16 %v1023_v30, %v1023_v30  ;;  %1139 = vmatpush.bf16.xpose.msra.mxu0 %v1130_v29 }
 0xb5b   : > { %1557 = vmatmul.msk.bf16.vlgmr.msrb.gmra.mxu2 %vm576_vm5, %v1032_v32 }
 0xb5c   : > { %v1071_v34 = vpop.f32.mrf.mxu1 }
 0xb60   : > { %v1029_v36 = vpop.permute.xlu0 %1028 }
 0xb61   : > { %v1034_v37 = vpack.c.bf16 %v1029_v36, %v1029_v36 }
 0xb63   : > { %1559 = vmatmul.msk.bf16.vlgmr.msra.gmra.mxu0 %vm576_vm5, %v1034_v37 }
 0xbdb   : > { %v1117_v40 = vpop.f32.mrf.mxu3 }
 0xbdc   : > { %v1151_v41 = vsel %vm576_vm5, %v1117_v40, -inf }
 0xbdd   : > { %1152 = vmax.xlane.f32.xlu0 %v1151_v41 }
 0xbde   : > { %v1093_v44 = vpop.f32.mrf.mxu2 }
 0xbdf   : > { %v1148_v45 = vsel %vm576_vm5, %v1093_v44, -inf }
 0xbe0   : > { %1149 = vmax.xlane.f32.xlu1 %v1148_v45  ;;  %v1141_v47 = vpop.f32.mrf.mxu0 }
 0xbe1   : > { %v1154_v43 = vsel %vm576_vm5, %v1141_v47, -inf }
 0xbe2   : > { %1155 = vmax.xlane.f32.xlu2 %v1154_v43 }
 0xbe3   : > { %v1119_v48 = vpop.f32.mrf.mxu3 }
 0xbe6   : > { %v1095_v49 = vpop.f32.mrf.mxu2 }
 0xbe8   : > { %v1143_v51 = vpop.f32.mrf.mxu0  ;;  %1146 = vmax.xlane.f32.xlu1 %v1145_v50 }
 0xc50   : > { %v1153_v52 = vpop.xlane.xlu0 %1152 }
 0xc51   : > { %v1159_v53 = vsub.f32 %v1117_v40, %v1153_v52 }
 0xc53   : > { %v1165_v55 = vmul.f32 1.442695, %v1159_v53  ;;  %v1150_v58 = vpop.xlane.xlu1 %1149 }
 0xc54   : > { %v1158_v59 = vsub.f32 %v1093_v44, %v1150_v58 }
 0xc55   : > { %1684 = vpow2.f32 %v1165_v55  ;;  %v1156_v60 = vpop.xlane.xlu2 %1155 }
 0xc56   : > { %v1163_v61 = vmul.f32 1.442695, %v1158_v59  ;;  %v1160_v62 = vsub.f32 %v1141_v47, %v1156_v60 }
 0xc58   : > { %1686 = vpow2.f32 %v1163_v61  ;;  %v1167_v63 = vmul.f32 1.442695, %v1160_v62 }
 0xc5a   : > { %1688 = vpow2.f32 %v1167_v63 }
 0xc5b   : > { %v1685_v1 = vpop.eup %1684  ;;  %v1147_v5 = vpop.xlane.xlu1 %1146 }
 0xc5c   : > { %v1175_v2 = vsel %vm576_vm5, %v1685_v1, 0.0  ;;  %v1157_v6 = vsub.f32 %v1069_v25, %v1147_v5 }
 0xc5d   : > { %1176 = vadd.xlane.f32.xlu2 %v1175_v2 }
 0xc5e   : > { %v1687_v35 = vpop.eup %1686  ;;  %v1161_v7 = vmul.f32 1.442695, %v1157_v6 }
 0xc5f   : > { %v1172_v3 = vsel %vm576_vm5, %v1687_v35, 0.0 }
 0xc60   : > { %v1689_v18 = vpop.eup %1688  ;;  %1173 = vadd.xlane.f32.xlu0 %v1172_v3  ;;  %1690 = vpow2.f32 %v1161_v7 }
 0xc61   : > { %v1178_v4 = vsel %vm576_vm5, %v1689_v18, 0.0 }
 0xc62   : > { %1179 = vadd.xlane.f32.xlu1 %v1178_v4 }
 0xc66   : > { %v1691_v8 = vpop.eup %1690 }
 0xc67   : > { %v1169_v9 = vsel %vm576_vm5, %v1691_v8, 0.0 }
 0xc74   : > { %1214 = vrot.lane.b32.xlu0 %v1075_v15, %s1847_s29 }
 0xc75   : > { %1235 = vrot.lane.b32.xlu2 %v2195_v14, %s1847_s29 }
 0xc7b   : > { %1256 = vrot.lane.b32.xlu1 %v1123_v19, %s1847_s29 }
 0xc7d   : > { %1193 = vrot.lane.b32.xlu2 %v2189_v17, %s1847_s29  ;;  %s1501_s29 = sshll.u32 %s434_s28, 3 }
 0xc7e   : > { %s436_s18 = scalar_lea.vmem [#allocation7], %s1501_s29 }
 0xc7f   : > { %s1409_s15 = sshll.u32 %s436_s18, 4  ;;  %s1410_s15 = int_to_ptr.vmem [resolvable:$true] %s1409_s15 }
 0xc9e   : > { %1170 = vadd.xlane.f32.xlu0 %v1169_v9 }
 0xcd0   : > { %v1177_v10 = vpop.xlane.xlu2 %1176 }
 0xcd1   : > { %1692 = vrcp.f32 %v1177_v10 }
 0xcd3   : > { %v1174_v21 = vpop.xlane.xlu0 %1173 }
 0xcd4   : > { %1694 = vrcp.f32 %v1174_v21 }
 0xcd5   : > { %v1180_v17 = vpop.xlane.xlu1 %1179 }
 0xcd6   : > { %1696 = vrcp.f32 %v1180_v17 }
 0xcd7   : > { %v1693_v16 = vpop.eup %1692 }
 0xcd8   : > { %v1187_v15 = vmul.f32 %v1693_v16, %v1685_v1  ;;  %v1236_v20 = vpop.permute.xlu2 %1235 }
 0xcd9   : > { %v1241_v14 = vsel %vm721_vm6, %v1236_v20, 0 }
 0xcda   : > { %v1191_v19 = vpack.c.bf16 %v1187_v15, %v1187_v15  ;;  %1250 = vmatpush.bf16.msra.mxu3 %v1241_v14  ;;  %v1695_v25 = vpop.eup %1694 }
 0xcdb   : > { %v1186_v26 = vmul.f32 %v1695_v25, %v1687_v35 }
 0xcdd   : > { %1562 = vmatmul.msk.bf16.vlgmr.msra.gmra.mxu3 %vm576_vm5, %v1191_v19  ;;  %v1190_v29 = vpack.c.bf16 %v1186_v26, %v1186_v26 }
 0xcde   : > { %1361 = vmatpush.bf16.msrb.mxu3 %v2129_v33 }
 0xce0   : > { %v1194_v22 = vpop.permute.xlu2 %1193 }
 0xce1   : > { %v1199_v24 = vsel %vm721_vm6, %v1194_v22, 0 }
 0xce2   : > { %1362 = vmatpush.bf16.msrb.mxu3 %v2136_v42  ;;  %1208 = vmatpush.bf16.msra.mxu1 %v1199_v24  ;;  %v1697_v42 = vpop.eup %1696 }
 0xce3   : > { %v1188_v30 = vmul.f32 %v1697_v42, %v1689_v18 }
 0xce6   : > { %1302 = vmatpush.bf16.msrb.mxu1 %v2097_v12  ;;  %1363 = vmatpush.bf16.msrb.mxu3 %v2145_v56  ;;  %v1215_v27 = vpop.permute.xlu0 %1214  ;;  %v1192_v56 = vpack.c.bf16 %v1188_v30, %v1188_v30 }
 0xce7   : > { %v1220_v33 = vsel %vm721_vm6, %v1215_v27, 0 }
 0xce8   : > { %1229 = vmatpush.bf16.msra.mxu2 %v1220_v33 }
 0xcea   : > { %1303 = vmatpush.bf16.msrb.mxu1 %v2103_v13  ;;  %1364 = vmatpush.bf16.msrb.mxu3 %v2151_v46 }
 0xceb   : > { %1561 = vmatmul.msk.bf16.vlgmr.msra.gmra.mxu2 %vm576_vm5, %v1190_v29 }
 0xcec   : > { %1344 = vmatpush.bf16.msrb.mxu2 %v2120_v38 }
 0xced   : > { %v1257_v32 = vpop.permute.xlu1 %1256 }
 0xcee   : > { %v1262_v12 = vsel %vm721_vm6, %v1257_v32, 0 }
 0xcef   : > { %1271 = vmatpush.bf16.msrb.mxu0 %v1262_v12 }
 0xcf0   : > { %1345 = vmatpush.bf16.msrb.mxu2 %v2123_v39 }
 0xcf2   : > { %1563 = vmatmul.msk.bf16.vlgmr.msrb.gmra.mxu0 %vm576_vm5, %v1192_v56 }
 0xd11   : > { %v1171_v13 = vpop.xlane.xlu0 %1170 }
 0xd12   : > { %1698 = vrcp.f32 %v1171_v13 }
 0xd18   : > { %v1699_v46 = vpop.eup %1698 }
 0xd19   : > { %v1185_v34 = vmul.f32 %v1699_v46, %v1691_v8 }
 0xd1b   : > { %v1189_v36 = vpack.c.bf16 %v1185_v34, %v1185_v34 }
 0xd1d   : > { %1560 = vmatmul.msk.bf16.vlgmr.msra.gmra.mxu1 %vm576_vm5, %v1189_v36 }
 0xd60   : > { %v1252_v38 = vpop.f32.mrf.mxu3 }
 0xd61   : > { %1282 = vrot.lane.b32.xlu2 %v1252_v38, %s2325_s19  ;;  %s1411_s19 = sshll.u32 %s1407_s16, 4  ;;  %s1412_s19 = int_to_ptr.hbm [resolvable:$true] %s1411_s19 }
 0xd62   : > { %s1780_s30 = sshra.s32 %s1412_s19, 4  ;;  %s1781_s30 = int_to_ptr.hbm [resolvable:$true] %s1780_s30 }
 0xd63   : > { %s1782_s29 = scalar_lea.hbm %s1781_s30, 8  ;;  %p1787_p3 = scmp.lt.s32.totalorder %s1781_s30, %s2313_s12 }
 0xd64   : > { %p1783_p0 = scmp.ne.s32.totalorder %s1781_s30, %s1782_s29 }
 0xd66   : > { %p1784_p1 = pnand %p1783_p0, %p1954_p5 }
 0xd68   : > { %v1254_v37 = vpop.f32.mrf.mxu3  ;;  %p1785_p2 = pneg %p1784_p1 }
 0xd6e   : > { %v1231_v40 = vpop.f32.mrf.mxu2 }
 0xd6f   : > { %1278 = vrot.lane.b32.xlu1 %v1231_v40, %s2326_s20  ;;  %v1273_v39 = vpop.f32.mrf.mxu0  ;;  %v1704_v40 = vld [vmem:[%s2311_s10] ss:$0 sm:$0xff]  ;;  %s1786_s20 = scalar_lea.hbm %s2313_s12, 16 }
 0xd70   : > { %p1788_p4 = scmp.lt.s32.totalorder %s1786_s20, %s1782_s29 }
 0xd72   : > { %p1789_p7 = por %p1788_p4, %p1787_p3 }
 0xd74   : > { %p1790_p8 = pnand %p1789_p7, %p1785_p2 }
 0xd76   : > { %v1233_v41 = vpop.f32.mrf.mxu2 }
 0xd77   : > { %1286 = vrot.lane.b32.xlu1 %v1273_v39, %s2327_s26  ;;  %v1275_v44 = vpop.f32.mrf.mxu0  ;;  %v1705_v41 = vld [vmem:[%s2312_s11] ss:$0 sm:$0xff] }
 0xd9a   : > { %v1210_v45 = vpop.f32.mrf.mxu1 }
 0xda2   : > { %v1212_v47 = vpop.f32.mrf.mxu1 }
 0xdbb   : > { %v1283_v49 = vpop.permute.xlu2 %1282 }
 0xde1   : > { %v1279_v43 = vpop.permute.xlu1 %1278 }
 0xde2   : > { %v1289_v48 = vsel %vm576_vm5, %v1210_v45, %v1279_v43 }
 0xde3   : > { %v1290_v51 = vsel %vm814_vm7, %v1289_v48, %v1283_v49 }
 0xde9   : > { %v1287_v50 = vpop.permute.xlu1 %1286 }
 0xdea   : > { %v1291_v52 = vsel %vm816_vm8, %v1290_v51, %v1287_v50 }
 0xdeb   : > { %v1292_v53 = vpack.c.bf16 %v1291_v52, %v1291_v52 }
 0xded   : > { %1564 = vmatmul.msk.bf16.vlgmr.msrb.gmra.mxu1 %vm478_vm0, %v1292_v53 }
 0xe6a   : > { %v1305_v55 = vpop.f32.mrf.mxu1 }
 0xe6b   : > { %v1306_v58 = vadd.f32 %v2113_v23, %v1305_v55 }
 0xe6d   : > { %v1309_v59 = vadd.f32 %v1306_v58, %v2179_v54 }
 0xe6f   : > { %v1310_v60 = vsel %vm478_vm0, %v1309_v59, 0.0 }
 0xe70   : > { %1311 = vadd.xlane.f32.xlu2 %v1310_v60 }
 0xe72   : > { %v1307_v61 = vpop.f32.mrf.mxu1 }
 0xee3   : > { %v1312_v62 = vpop.xlane.xlu2 %1311 }
 0xee4   : > { %v1313_v63 = vmul.f32 %v1312_v62, %v1995_v11 }
 0xee6   : > { %v1314_v1 = vsub.f32 %v1309_v59, %v1313_v63 }
 0xee8   : > { %v1315_v2 = vmul.f32 %v1314_v1, %v1314_v1 }
 0xeea   : > { %v1316_v35 = vsel %vm478_vm0, %v1315_v2, 0.0 }
 0xeeb   : > { %1317 = vadd.xlane.f32.xlu1 %v1316_v35 }
 0xf5e   : > { %v1318_v3 = vpop.xlane.xlu1 %1317 }
 0xf5f   : > { %v1319_v18 = vmul.f32 %v1318_v3, %v1995_v11 }
 0xf61   : > { %v1320_v4 = vadd.f32 1e-05, %v1319_v18 }
 0xf63   : > { %1700 = vrsqrt.f32 %v1320_v4  ;;  %vm1327_vm5 = vweird.f32 %v1320_v4 }
 0xf69   : > { %v1701_v23 = vpop.eup %1700 }
 0xf6a   : > { %v1322_v5 = vmul.f32 %v1701_v23, %v1320_v4  ;;  %vm1328_vm4 = vweird.f32 %v1701_v23 }
 0xf6b   : > { %vm1329_vm6 = vmor %vm1327_vm5, %vm1328_vm4 }
 0xf6c   : > { %v1323_v54 = vmul.f32 %v1701_v23, %v1322_v5 }
 0xf6e   : > { %v1324_v6 = vmul.f32 0.5, %v1323_v54 }
 0xf70   : > { %v1325_v7 = vsub.f32 1.5, %v1324_v6 }
 0xf72   : > { %v1326_v8 = vmul.f32 %v1701_v23, %v1325_v7 }
 0xf74   : > { %v1330_v9 = vsel %vm1329_vm6, %v1701_v23, %v1326_v8 }
 0xf75   : > { %v1331_v10 = vmul.f32 %v1330_v9, %v1314_v1 }
 0xf77   : > { %v1332_v16 = vmul.f32 %v2015_v28, %v1331_v10 }
 0xf79   : > { %v1333_v15 = vadd.f32 %v2020_v31, %v1332_v16 }
 0xf7b   : > { %v1334_v20 = vpack.c.bf16 %v1333_v15, %v1333_v15 }
 0xf7d   : > { %1565 = vmatmul.msk.bf16.vlgmr.msrb.gmra.mxu2 %vm478_vm0, %v1334_v20 }
0x1000   : > { %v1347_v21 = vpop.f32.mrf.mxu2 }
0x1001   : > { %v1348_v14 = vadd.f32 %v2157_v57, %v1347_v21 }
0x1003   : > { %v1351_v19 = vmax.f32 %v1348_v14, 0.0 }
0x1005   : > { %v1352_v17 = vmul.f32 %v1351_v19, %v1351_v19 }
0x1007   : > { %v1353_v22 = vpack.c.bf16 %v1352_v17, %v1352_v17 }
0x1008   : > { %v1349_v24 = vpop.f32.mrf.mxu2 }
0x1009   : > { %1566 = vmatmul.msk.bf16.vlgmr.msrb.gmra.mxu3 %vm937_vm12, %v1353_v22 }
0x108c   : > { %v1366_v25 = vpop.f32.mrf.mxu3 }
0x108d   : > { %v1367_v26 = vadd.f32 %v2164_v0, %v1366_v25 }
0x108f   : > { %v1370_v27 = vadd.f32 %v1367_v26, %v1333_v15 }
0x1091   : > { %v1371_v28 = vsel %vm478_vm0, %v1370_v27, 0.0 }
0x1092   : > { %1372 = vadd.xlane.f32.xlu0 %v1371_v28 }
0x1094   : > { %v1368_v31 = vpop.f32.mrf.mxu3 }
0x1105   : > { %v1373_v33 = vpop.xlane.xlu0 %1372 }
0x1106   : > { %v1374_v42 = vmul.f32 %v1373_v33, %v1995_v11 }
0x1108   : > { %v1375_v29 = vsub.f32 %v1370_v27, %v1374_v42 }
0x110a   : > { %v1376_v57 = vmul.f32 %v1375_v29, %v1375_v29 }
0x110c   : > { %v1377_v30 = vsel %vm478_vm0, %v1376_v57, 0.0 }
0x110d   : > { %1378 = vadd.xlane.f32.xlu0 %v1377_v30 }
0x1180   : > { %v1379_v32 = vpop.xlane.xlu0 %1378 }
0x1181   : > { %v1380_v12 = vmul.f32 %v1379_v32, %v1995_v11 }
0x1183   : > { %v1381_v56 = vadd.f32 1e-05, %v1380_v12 }
0x1185   : > { %1702 = vrsqrt.f32 %v1381_v56  ;;  %vm1388_vm8 = vweird.f32 %v1381_v56 }
0x118b   : > { %v1703_v0 = vpop.eup %1702 }
0x118c   : > { %v1383_v13 = vmul.f32 %v1703_v0, %v1381_v56  ;;  %vm1389_vm7 = vweird.f32 %v1703_v0 }
0x118d   : > { %vm1390_vm9 = vmor %vm1388_vm8, %vm1389_vm7 }
0x118e   : > { %v1384_v46 = vmul.f32 %v1703_v0, %v1383_v13 }
0x1190   : > { %v1385_v34 = vmul.f32 0.5, %v1384_v46 }
0x1192   : > { %v1386_v36 = vsub.f32 1.5, %v1385_v34 }
0x1194   : > { %v1387_v38 = vmul.f32 %v1703_v0, %v1386_v36 }
0x1196   : > { %v1391_v37 = vsel %vm1390_vm9, %v1703_v0, %v1387_v38 }
0x1197   : > { %v1392_v11 = vmul.f32 %v1391_v37, %v1375_v29 }
0x1199   : > { %v1393_v39 = vmul.f32 %v1704_v40, %v1392_v11 }
0x119b   : > { %v1394_v44 = vadd.f32 %v1705_v41, %v1393_v39 }
0x119d   : > { %1395 = vst.msk [vmem:[%s436_s18] sm:$0xff] %vm478_vm0, %v1394_v44 }
0x119e   : > { %1793 = shalt.err (!%p1790_p8)
}
0x119f   : > { %1589 = dma.vmem_to_hbm [thread:$0]  (%p1954_p5), %s1410_s15, 128, %s1412_s19, %s1397_s17  }
0x11a0 PF: > { %p1606_p9 = scmp.ge.s32.totalorder %s1836_s24, 2  ;;  %s1423_s28 = sand.u32 1, %s1824_s21  }
0x11a1   : > { %s1424_s18 = scalar_lea.sflag [#allocation4], %s1423_s28 }
0x11a2   : > { %p1599_p10 = pnand %p1606_p9, %p1958_p6 }
0x11a4   : > { %p1600_p11 = pneg %p1599_p10 }
0x11a6   : > { %1819 = dma.done.wait (%p1600_p11), %s1424_s18, 128  }
0x11a7   : > { %1821 = vsyncadd (%p1600_p11), %s1424_s18, 4294967168  ;;  %s2328_s25 = sld [smem:[#allocation11_spill]]  ;;  %p24_p12 = scmp.ge.s32.totalorder %s1941_s27, 4  }
0x11a8   : > { %s2329_s23 = sld [smem:[#allocation12_spill]]  ;;  %s2330_s21 = smov %s1828_s22 }
0x11a9   : > { %s2332_s24 = smov %s1941_s27  ;;  %26 = sbr.rel (!%p24_p12) target bundleno = 7 (0x7), region = 112 }
0x11ad   : > { %s2331_s22 = smov %s2328_s25 }
0x11ae   :  { %1430 = vsyncpa [#allocation3], 1 }
0x11af   :  { %1432 = vsyncpa [#allocation3 + $0x1], 1 }
0x11b0   :  { %1433 = vsyncpa [#allocation6], 1 }
0x11b1   :  { %1434 = vsyncpa [#allocation4], 1 }
0x11b2   :  { %1436 = vsyncpa [#allocation4 + $0x1], 1 }

</bundles_post_ra>
